<compile_context>
chip_gen: v7x
topology: tpu7x:2x2x1
jax: 0.10.0
libtpu: 0.0.40
codegen_flags: <defaults>
</compile_context>

<pallas_src>
import functools

import numpy as np
import jax
import jax.numpy as jnp
from jax.experimental import pallas as pl
from jax.experimental.pallas import tpu as pltpu

EPS = 1e-5  # torch.nn.GroupNorm default


def random_layer_kernel(x_ref, d_ref, s_ref, w1_ref, w2_ref,
                        affm_ref, affo_ref, gm_mid_ref, gm_out_ref,
                        o_ref, *, bblk, H):
    f32, bf16 = jnp.float32, jnp.bfloat16
    M = bblk * H

    x = x_ref[...]                        # (M, W*C)  f32, lane-dense
    d = d_ref[...]                        # (M, W*C)  f32
    s_big = s_ref[...]                    # (2M, M)   bf16 block-diag row shifts
    gm_mid = gm_mid_ref[...]              # (W*Cmid, W*Cmid) f32, pre-scaled 1/cnt
    gm_out = gm_out_ref[...]              # (W*C,    W*C)    f32, pre-scaled 1/cnt
    am = affm_ref[...]                    # (2, W*Cmid)  [gamma1; beta1]
    ao = affo_ref[...]                    # (4, W*C)     [g2; b2; g3; b3]

    def conv3x3(z, wcat):
        # z: (M, L) f32.  One shift matmul (dy=-1 and dy=+1 stacked along
        # rows; dy=0 is the identity and reuses z directly), then one fused
        # K = 3L matmul against the concatenated banded weights.
        zb = z.astype(bf16)
        sh = jnp.dot(s_big, zb, preferred_element_type=f32).astype(bf16)  # (2M, L)
        zc = jnp.concatenate([sh[:M], zb, sh[M:]], axis=1)                # (M, 3L)
        return jnp.dot(zc, wcat, preferred_element_type=f32)              # (M, Lout)

    def group_norm(z, gamma, beta, gmat):
        # z: (M, L) f32; gamma/beta: (1, L); gmat pre-scaled by 1/count.
        L = z.shape[-1]
        z3 = z.reshape(bblk, H, L)
        s1 = jnp.sum(z3, axis=1)                                  # (Bblk, L)
        s2 = jnp.sum(z3 * z3, axis=1)                             # (Bblk, L)
        st = jnp.concatenate([s1, s2], axis=0)                    # (2*Bblk, L)
        g = jnp.dot(st, gmat, preferred_element_type=f32)         # [means; E[x^2]]
        mean, ex2 = g[:bblk], g[bblk:]
        var = jnp.maximum(ex2 - mean * mean, 0.0)
        a = jax.lax.rsqrt(var + EPS) * gamma                      # (Bblk, L)
        b = beta - mean * a
        return (z3 * a[:, None, :] + b[:, None, :]).reshape(M, L)

    # conv1 -> relu -> norm1
    y = group_norm(jnp.maximum(conv3x3(x, w1_ref[...]), 0.0),
                   am[0:1], am[1:2], gm_mid)
    # norm2(d + conv2(y))
    n2 = group_norm(d + conv3x3(y, w2_ref[...]), ao[0:1], ao[1:2], gm_out)
    # norm3(relu(x + .))
    r = jnp.maximum(x + n2, 0.0)
    o_ref[...] = group_norm(r, ao[2:3], ao[3:4], gm_out).astype(o_ref.dtype)


# ---------------- host-side parameter repacking ----------------
def _banded_weights_cat(w_pt, W):
    """PyTorch (Cout, Cin, 3, 3) conv weight -> one (3*W*Cin, W*Cout) bf16
    matrix: per dy tap, the width shift dx and the channel contraction are
    baked into a banded (W*Cin, W*Cout) block; the three dy blocks are
    concatenated along K so the conv becomes a single matmul."""
    w_np = np.asarray(w_pt, dtype=np.float32)            # (Cout, Cin, 3, 3)
    Cout, Cin = w_np.shape[0], w_np.shape[1]
    wk = np.transpose(w_np, (2, 3, 1, 0))                # (3, 3, Cin, Cout)
    big = np.zeros((3, W * Cin, W * Cout), np.float32)
    for i in range(3):                                   # dy tap
        for j in range(3):                               # dx tap
            off = j - 1
            for wp in range(W):                          # output column
                wi = wp + off                            # input column
                if 0 <= wi < W:
                    big[i,
                        wi * Cin:(wi + 1) * Cin,
                        wp * Cout:(wp + 1) * Cout] = wk[i, j]
    return jnp.asarray(big.reshape(3 * W * Cin, W * Cout), dtype=jnp.bfloat16)


def _shift_block_matrix(H, bblk):
    """(2M, M) bf16 matrix: rows [0, M) produce the dy=-1 shifted copy, rows
    [M, 2M) the dy=+1 copy.  Block-diagonal per sample (rows never leak across
    the H boundary of a sample); dy=0 is the identity and is not built."""
    M = bblk * H
    s = np.zeros((2 * M, M), np.float32)
    for r in range(M):
        if r % H != 0:
            s[r, r - 1] = 1.0            # (S_up @ x)[r]   = x[r-1]
        if r % H != H - 1:
            s[M + r, r + 1] = 1.0        # (S_down @ x)[r] = x[r+1]
    return jnp.asarray(s, dtype=jnp.bfloat16)


def _group_matrix_lanes(W, C, num_groups, H):
    """(W*C, W*C) f32 matrix with 1/count where two lanes share a group, so a
    single matmul both gathers the per-group stats and broadcasts the mean /
    E[x^2] back to every lane of the group."""
    gs = C // num_groups
    lanes = np.arange(W * C)
    gidx = (lanes % C) // gs
    same = (gidx[:, None] == gidx[None, :]).astype(np.float32)
    return jnp.asarray(same / float(H * W * gs))


def _pick_block_b(B, max_bb=8):
    """Largest divisor of B that is <= max_bb while keeping >= 2 grid steps
    (so both v7x TensorCores get work)."""
    best = 1
    for bb in range(1, min(max_bb, B) + 1):
        if B % bb == 0 and (B // bb >= 2 or B == 1):
            best = bb
    return best


def random_layer_forward(x, d, w1_pt, w2_pt, g1, b1, g2, b2, g3, b3, *,
                         num_groups, block_b=None):
    """x, d: (B, C, H, W) NCHW (PyTorch layout).  w*_pt: (Cout, Cin, 3, 3)."""
    B, C, H, W = x.shape
    Cmid = w1_pt.shape[0]
    assert C % num_groups == 0 and Cmid % num_groups == 0
    WC, WCmid = W * C, W * Cmid

    bblk = block_b if block_b is not None else _pick_block_b(B)
    assert B % bblk == 0
    M = bblk * H
    assert M % 8 == 0, "Bblk*H must be a multiple of 8 (sublane constraint)"

    # NCHW -> lane-dense (B*H, W*C) slab (layout plumbing outside the kernel)
    x2 = jnp.transpose(x, (0, 2, 3, 1)).reshape(B * H, WC).astype(jnp.float32)
    d2 = jnp.transpose(d, (0, 2, 3, 1)).reshape(B * H, WC).astype(jnp.float32)

    w1cat = _banded_weights_cat(w1_pt, W)           # (3*W*C,    W*Cmid) bf16
    w2cat = _banded_weights_cat(w2_pt, W)           # (3*W*Cmid, W*C)    bf16
    s_big = _shift_block_matrix(H, bblk)            # (2M, M)            bf16
    gm_mid = _group_matrix_lanes(W, Cmid, num_groups, H)   # pre-scaled 1/count
    gm_out = _group_matrix_lanes(W, C, num_groups, H)

    lane = lambda v: jnp.tile(jnp.asarray(v, jnp.float32), W)
    aff_mid = jnp.stack([lane(g1), lane(b1)], axis=0)                   # (2, W*Cmid)
    aff_out = jnp.stack([lane(g2), lane(b2), lane(g3), lane(b3)], axis=0)  # (4, W*C)

    kernel = functools.partial(random_layer_kernel, bblk=bblk, H=H)

    def full_spec(arr):
        zeros = (0,) * arr.ndim
        return pl.BlockSpec(arr.shape, lambda b, _z=zeros: _z)

    batched = pl.BlockSpec((M, WC), lambda b: (b, 0))

    out2 = pl.pallas_call(
        kernel,
        out_shape=jax.ShapeDtypeStruct((B * H, WC), jnp.float32),
        grid=(B // bblk,),
        in_specs=[
            batched, batched,                        # x, d (lane-dense slabs)
            full_spec(s_big),                        # block-diag row shifts
            full_spec(w1cat), full_spec(w2cat),      # fused banded conv weights
            full_spec(aff_mid), full_spec(aff_out),  # packed GN affine rows
            full_spec(gm_mid), full_spec(gm_out),    # pre-scaled group matrices
        ],
        out_specs=pl.BlockSpec((M, WC), lambda b: (b, 0)),
        compiler_params=pltpu.CompilerParams(
            dimension_semantics=("parallel",)),      # v7x: batch across 2 TCs
    )(x2, d2, s_big, w1cat, w2cat, aff_mid, aff_out, gm_mid, gm_out)

    # lane-dense (B*H, W*C) -> NCHW
    return jnp.transpose(out2.reshape(B, H, W, C), (0, 3, 1, 2))


# ---------------- pure-JAX reference (for verification) ----------------
def _ref_conv(x, w):
    return jax.lax.conv_general_dilated(
        x, w, window_strides=(1, 1), padding='SAME',
        dimension_numbers=('NCHW', 'OIHW', 'NCHW'),
        precision=jax.lax.Precision.HIGHEST)


def _ref_group_norm(x, gamma, beta, num_groups):
    B, C, H, W = x.shape
    gs = C // num_groups
    xr = x.reshape(B, num_groups, gs, H, W)
    mean = xr.mean(axis=(2, 3, 4), keepdims=True)
    var = xr.var(axis=(2, 3, 4), keepdims=True)
    xn = ((xr - mean) * jax.lax.rsqrt(var + EPS)).reshape(B, C, H, W)
    return xn * gamma[None, :, None, None] + beta[None, :, None, None]


def ref_forward(x, d, w1, w2, g1, b1, g2, b2, g3, b3, num_groups):
    y = _ref_group_norm(jax.nn.relu(_ref_conv(x, w1)), g1, b1, num_groups)
    t = _ref_group_norm(d + _ref_conv(y, w2), g2, b2, num_groups)
    return _ref_group_norm(jax.nn.relu(x + t), g3, b3, num_groups)


if __name__ == "__main__":
    B, C, Cmid, H, W = 8, 8, 16, 16, 16
    num_groups = 8

    key = jax.random.PRNGKey(0)
    kx, kd, kw1, kw2, kaff = jax.random.split(key, 5)

    # PyTorch layouts: NCHW activations, (Cout, Cin, kH, kW) conv weights.
    x = jax.random.normal(kx, (B, C, H, W), jnp.float32)
    d = jax.random.normal(kd, (B, C, H, W), jnp.float32)
    w1 = 0.01 * jax.random.normal(kw1, (Cmid, C, 3, 3), jnp.float32)
    w2 = 0.01 * jax.random.normal(kw2, (C, Cmid, 3, 3), jnp.float32)

    # GroupNorm affine params (perturbed from the weight=1 / bias=0 default so
    # the affine path is actually exercised).
    kg1, kb1, kg2, kb2, kg3, kb3 = jax.random.split(kaff, 6)
    g1 = 1.0 + 0.05 * jax.random.normal(kg1, (Cmid,), jnp.float32)
    b1 = 0.05 * jax.random.normal(kb1, (Cmid,), jnp.float32)
    g2 = 1.0 + 0.05 * jax.random.normal(kg2, (C,), jnp.float32)
    b2 = 0.05 * jax.random.normal(kb2, (C,), jnp.float32)
    g3 = 1.0 + 0.05 * jax.random.normal(kg3, (C,), jnp.float32)
    b3 = 0.05 * jax.random.normal(kb3, (C,), jnp.float32)

    out = random_layer_forward(x, d, w1, w2, g1, b1, g2, b2, g3, b3,
                               num_groups=num_groups)
    out = jax.block_until_ready(out)

    ref = ref_forward(x, d, w1, w2, g1, b1, g2, b2, g3, b3, num_groups)
    assert out.shape == (B, C, H, W)
    # Conv/shift matmul operands are bf16 (GroupNorm math stays f32), so allow
    # a bf16-level tolerance vs the f32 reference; structural errors are O(1).
    assert bool(jnp.allclose(out, ref, atol=1e-2, rtol=1e-2)), \
        "mismatch vs reference"

    print("KERNEL_OK")
</pallas_src>

<mosaic_0001>
module attributes {stable_mosaic.version = 11 : i64} {
  func.func @random_layer_kernel(%arg0: i32, %arg1: memref<64x128xf32, #tpu.memory_space<vmem>>, %arg2: memref<64x128xf32, #tpu.memory_space<vmem>>, %arg3: memref<128x64xbf16, #tpu.memory_space<vmem>>, %arg4: memref<384x256xbf16, #tpu.memory_space<vmem>>, %arg5: memref<768x128xbf16, #tpu.memory_space<vmem>>, %arg6: memref<2x256xf32, #tpu.memory_space<vmem>>, %arg7: memref<4x128xf32, #tpu.memory_space<vmem>>, %arg8: memref<256x256xf32, #tpu.memory_space<vmem>>, %arg9: memref<128x128xf32, #tpu.memory_space<vmem>>, %arg10: memref<64x128xf32, #tpu.memory_space<vmem>>) attributes {dimension_semantics = [#tpu.dimension_semantics<parallel>], iteration_bounds = array<i64: 2>, scalar_prefetch = 0 : i64, scratch_operands = 0 : i64, tpu.core_type = #tpu.core_type<tc>, window_params = [{transform_indices = @transform_0, window_bounds = array<i64: 64, 128>}, {transform_indices = @transform_1, window_bounds = array<i64: 64, 128>}, {pipeline_mode = #tpu.pipeline_mode<synchronous>, transform_indices = @transform_2, window_bounds = array<i64: 128, 64>}, {pipeline_mode = #tpu.pipeline_mode<synchronous>, transform_indices = @transform_3, window_bounds = array<i64: 384, 256>}, {pipeline_mode = #tpu.pipeline_mode<synchronous>, transform_indices = @transform_4, window_bounds = array<i64: 768, 128>}, {pipeline_mode = #tpu.pipeline_mode<synchronous>, transform_indices = @transform_5, window_bounds = array<i64: 2, 256>}, {pipeline_mode = #tpu.pipeline_mode<synchronous>, transform_indices = @transform_6, window_bounds = array<i64: 4, 128>}, {pipeline_mode = #tpu.pipeline_mode<synchronous>, transform_indices = @transform_7, window_bounds = array<i64: 256, 256>}, {pipeline_mode = #tpu.pipeline_mode<synchronous>, transform_indices = @transform_8, window_bounds = array<i64: 128, 128>}, {transform_indices = @transform_9, window_bounds = array<i64: 64, 128>}]} {
    %c0 = arith.constant 0 : index
    %c0_0 = arith.constant 0 : index
    %0 = vector.load %arg1[%c0, %c0_0] : memref<64x128xf32, #tpu.memory_space<vmem>>, vector<64x128xf32>
    %c0_1 = arith.constant 0 : index
    %c0_2 = arith.constant 0 : index
    %1 = vector.load %arg2[%c0_1, %c0_2] : memref<64x128xf32, #tpu.memory_space<vmem>>, vector<64x128xf32>
    %c0_3 = arith.constant 0 : index
    %c0_4 = arith.constant 0 : index
    %2 = vector.load %arg3[%c0_3, %c0_4] : memref<128x64xbf16, #tpu.memory_space<vmem>>, vector<128x64xbf16>
    %c0_5 = arith.constant 0 : index
    %c0_6 = arith.constant 0 : index
    %3 = vector.load %arg8[%c0_5, %c0_6] : memref<256x256xf32, #tpu.memory_space<vmem>>, vector<256x256xf32>
    %c0_7 = arith.constant 0 : index
    %c0_8 = arith.constant 0 : index
    %4 = vector.load %arg9[%c0_7, %c0_8] : memref<128x128xf32, #tpu.memory_space<vmem>>, vector<128x128xf32>
    %c0_9 = arith.constant 0 : index
    %c0_10 = arith.constant 0 : index
    %5 = vector.load %arg6[%c0_9, %c0_10] : memref<2x256xf32, #tpu.memory_space<vmem>>, vector<2x256xf32>
    %c0_11 = arith.constant 0 : index
    %c0_12 = arith.constant 0 : index
    %6 = vector.load %arg7[%c0_11, %c0_12] : memref<4x128xf32, #tpu.memory_space<vmem>>, vector<4x128xf32>
    %c0_13 = arith.constant 0 : index
    %c0_14 = arith.constant 0 : index
    %7 = vector.load %arg4[%c0_13, %c0_14] : memref<384x256xbf16, #tpu.memory_space<vmem>>, vector<384x256xbf16>
    %8 = arith.truncf %0 : vector<64x128xf32> to vector<64x128xbf16>
    %cst = arith.constant dense<0.000000e+00> : vector<128x128xf32>
    %9 = tpu.matmul %2, %8, %cst {dimension_numbers = #tpu.dot_dimension_numbers<[1], [0], [0], [1], [0, 0, 1, 1], [], []>} : vector<128x64xbf16>, vector<64x128xbf16>, vector<128x128xf32> -> vector<128x128xf32>
    %10 = arith.truncf %9 : vector<128x128xf32> to vector<128x128xbf16>
    %11 = vector.extract_strided_slice %10 {offsets = [0, 0], sizes = [64, 128], strides = [1, 1]} : vector<128x128xbf16> to vector<64x128xbf16>
    %12 = vector.extract_strided_slice %10 {offsets = [64, 0], sizes = [64, 128], strides = [1, 1]} : vector<128x128xbf16> to vector<64x128xbf16>
    %13 = tpu.concatenate %11, %8, %12 in 1 : vector<64x128xbf16>, vector<64x128xbf16>, vector<64x128xbf16> -> vector<64x384xbf16>
    %cst_15 = arith.constant dense<0.000000e+00> : vector<64x256xf32>
    %14 = tpu.matmul %13, %7, %cst_15 {dimension_numbers = #tpu.dot_dimension_numbers<[1], [0], [0], [1], [0, 0, 1, 1], [], []>} : vector<64x384xbf16>, vector<384x256xbf16>, vector<64x256xf32> -> vector<64x256xf32>
    %cst_16 = arith.constant 0.000000e+00 : f32
    %15 = vector.broadcast %cst_16 : f32 to vector<64x256xf32>
    %16 = arith.maximumf %14, %15 : vector<64x256xf32>
    %17 = vector.extract_strided_slice %5 {offsets = [0, 0], sizes = [1, 256], strides = [1, 1]} : vector<2x256xf32> to vector<1x256xf32>
    %18 = vector.extract_strided_slice %5 {offsets = [1, 0], sizes = [1, 256], strides = [1, 1]} : vector<2x256xf32> to vector<1x256xf32>
    %19 = vector.shape_cast %16 : vector<64x256xf32> to vector<4x16x256xf32>
    %cst_17 = arith.constant dense<0.000000e+00> : vector<4x256xf32>
    %20 = vector.multi_reduction <add>, %19, %cst_17 [1] : vector<4x16x256xf32> to vector<4x256xf32>
    %21 = arith.mulf %19, %19 : vector<4x16x256xf32>
    %cst_18 = arith.constant dense<0.000000e+00> : vector<4x256xf32>
    %22 = vector.multi_reduction <add>, %21, %cst_18 [1] : vector<4x16x256xf32> to vector<4x256xf32>
    %23 = tpu.concatenate %20, %22 in 0 : vector<4x256xf32>, vector<4x256xf32> -> vector<8x256xf32>
    %cst_19 = arith.constant dense<0.000000e+00> : vector<8x256xf32>
    %24 = tpu.matmul %23, %3, %cst_19 {dimension_numbers = #tpu.dot_dimension_numbers<[1], [0], [0], [1], [0, 0, 1, 1], [], []>} : vector<8x256xf32>, vector<256x256xf32>, vector<8x256xf32> -> vector<8x256xf32>
    %25 = vector.extract_strided_slice %24 {offsets = [0, 0], sizes = [4, 256], strides = [1, 1]} : vector<8x256xf32> to vector<4x256xf32>
    %26 = vector.extract_strided_slice %24 {offsets = [4, 0], sizes = [4, 256], strides = [1, 1]} : vector<8x256xf32> to vector<4x256xf32>
    %27 = arith.mulf %25, %25 : vector<4x256xf32>
    %28 = arith.subf %26, %27 : vector<4x256xf32>
    %cst_20 = arith.constant 0.000000e+00 : f32
    %29 = vector.broadcast %cst_20 : f32 to vector<4x256xf32>
    %30 = arith.maximumf %28, %29 : vector<4x256xf32>
    %cst_21 = arith.constant 9.99999974E-6 : f32
    %31 = vector.broadcast %cst_21 : f32 to vector<4x256xf32>
    %32 = arith.addf %30, %31 : vector<4x256xf32>
    %33 = math.rsqrt %32 : vector<4x256xf32>
    %34 = vector.broadcast %17 : vector<1x256xf32> to vector<4x256xf32>
    %35 = arith.mulf %33, %34 : vector<4x256xf32>
    %36 = arith.mulf %25, %35 : vector<4x256xf32>
    %37 = vector.broadcast %18 : vector<1x256xf32> to vector<4x256xf32>
    %38 = arith.subf %37, %36 : vector<4x256xf32>
    %39 = vector.shape_cast %35 : vector<4x256xf32> to vector<4x1x256xf32>
    %40 = vector.broadcast %39 : vector<4x1x256xf32> to vector<4x16x256xf32>
    %41 = arith.mulf %19, %40 : vector<4x16x256xf32>
    %42 = vector.shape_cast %38 : vector<4x256xf32> to vector<4x1x256xf32>
    %43 = vector.broadcast %42 : vector<4x1x256xf32> to vector<4x16x256xf32>
    %44 = arith.addf %41, %43 : vector<4x16x256xf32>
    %45 = vector.shape_cast %44 : vector<4x16x256xf32> to vector<64x256xf32>
    %c0_22 = arith.constant 0 : index
    %c0_23 = arith.constant 0 : index
    %46 = vector.load %arg5[%c0_22, %c0_23] : memref<768x128xbf16, #tpu.memory_space<vmem>>, vector<768x128xbf16>
    %47 = arith.truncf %45 : vector<64x256xf32> to vector<64x256xbf16>
    %cst_24 = arith.constant dense<0.000000e+00> : vector<128x256xf32>
    %48 = tpu.matmul %2, %47, %cst_24 {dimension_numbers = #tpu.dot_dimension_numbers<[1], [0], [0], [1], [0, 0, 1, 1], [], []>} : vector<128x64xbf16>, vector<64x256xbf16>, vector<128x256xf32> -> vector<128x256xf32>
    %49 = arith.truncf %48 : vector<128x256xf32> to vector<128x256xbf16>
    %50 = vector.extract_strided_slice %49 {offsets = [0, 0], sizes = [64, 256], strides = [1, 1]} : vector<128x256xbf16> to vector<64x256xbf16>
    %51 = vector.extract_strided_slice %49 {offsets = [64, 0], sizes = [64, 256], strides = [1, 1]} : vector<128x256xbf16> to vector<64x256xbf16>
    %52 = tpu.concatenate %50, %47, %51 in 1 : vector<64x256xbf16>, vector<64x256xbf16>, vector<64x256xbf16> -> vector<64x768xbf16>
    %cst_25 = arith.constant dense<0.000000e+00> : vector<64x128xf32>
    %53 = tpu.matmul %52, %46, %cst_25 {dimension_numbers = #tpu.dot_dimension_numbers<[1], [0], [0], [1], [0, 0, 1, 1], [], []>} : vector<64x768xbf16>, vector<768x128xbf16>, vector<64x128xf32> -> vector<64x128xf32>
    %54 = arith.addf %1, %53 : vector<64x128xf32>
    %55 = vector.extract_strided_slice %6 {offsets = [0, 0], sizes = [1, 128], strides = [1, 1]} : vector<4x128xf32> to vector<1x128xf32>
    %56 = vector.extract_strided_slice %6 {offsets = [1, 0], sizes = [1, 128], strides = [1, 1]} : vector<4x128xf32> to vector<1x128xf32>
    %57 = vector.shape_cast %54 : vector<64x128xf32> to vector<4x16x128xf32>
    %cst_26 = arith.constant dense<0.000000e+00> : vector<4x128xf32>
    %58 = vector.multi_reduction <add>, %57, %cst_26 [1] : vector<4x16x128xf32> to vector<4x128xf32>
    %59 = arith.mulf %57, %57 : vector<4x16x128xf32>
    %cst_27 = arith.constant dense<0.000000e+00> : vector<4x128xf32>
    %60 = vector.multi_reduction <add>, %59, %cst_27 [1] : vector<4x16x128xf32> to vector<4x128xf32>
    %61 = tpu.concatenate %58, %60 in 0 : vector<4x128xf32>, vector<4x128xf32> -> vector<8x128xf32>
    %cst_28 = arith.constant dense<0.000000e+00> : vector<8x128xf32>
    %62 = tpu.matmul %61, %4, %cst_28 {dimension_numbers = #tpu.dot_dimension_numbers<[1], [0], [0], [1], [0, 0, 1, 1], [], []>} : vector<8x128xf32>, vector<128x128xf32>, vector<8x128xf32> -> vector<8x128xf32>
    %63 = vector.extract_strided_slice %62 {offsets = [0, 0], sizes = [4, 128], strides = [1, 1]} : vector<8x128xf32> to vector<4x128xf32>
    %64 = vector.extract_strided_slice %62 {offsets = [4, 0], sizes = [4, 128], strides = [1, 1]} : vector<8x128xf32> to vector<4x128xf32>
    %65 = arith.mulf %63, %63 : vector<4x128xf32>
    %66 = arith.subf %64, %65 : vector<4x128xf32>
    %cst_29 = arith.constant 0.000000e+00 : f32
    %67 = vector.broadcast %cst_29 : f32 to vector<4x128xf32>
    %68 = arith.maximumf %66, %67 : vector<4x128xf32>
    %cst_30 = arith.constant 9.99999974E-6 : f32
    %69 = vector.broadcast %cst_30 : f32 to vector<4x128xf32>
    %70 = arith.addf %68, %69 : vector<4x128xf32>
    %71 = math.rsqrt %70 : vector<4x128xf32>
    %72 = vector.broadcast %55 : vector<1x128xf32> to vector<4x128xf32>
    %73 = arith.mulf %71, %72 : vector<4x128xf32>
    %74 = arith.mulf %63, %73 : vector<4x128xf32>
    %75 = vector.broadcast %56 : vector<1x128xf32> to vector<4x128xf32>
    %76 = arith.subf %75, %74 : vector<4x128xf32>
    %77 = vector.shape_cast %73 : vector<4x128xf32> to vector<4x1x128xf32>
    %78 = vector.broadcast %77 : vector<4x1x128xf32> to vector<4x16x128xf32>
    %79 = arith.mulf %57, %78 : vector<4x16x128xf32>
    %80 = vector.shape_cast %76 : vector<4x128xf32> to vector<4x1x128xf32>
    %81 = vector.broadcast %80 : vector<4x1x128xf32> to vector<4x16x128xf32>
    %82 = arith.addf %79, %81 : vector<4x16x128xf32>
    %83 = vector.shape_cast %82 : vector<4x16x128xf32> to vector<64x128xf32>
    %84 = arith.addf %0, %83 : vector<64x128xf32>
    %cst_31 = arith.constant 0.000000e+00 : f32
    %85 = vector.broadcast %cst_31 : f32 to vector<64x128xf32>
    %86 = arith.maximumf %84, %85 : vector<64x128xf32>
    %87 = vector.extract_strided_slice %6 {offsets = [2, 0], sizes = [1, 128], strides = [1, 1]} : vector<4x128xf32> to vector<1x128xf32>
    %88 = vector.extract_strided_slice %6 {offsets = [3, 0], sizes = [1, 128], strides = [1, 1]} : vector<4x128xf32> to vector<1x128xf32>
    %89 = vector.shape_cast %86 : vector<64x128xf32> to vector<4x16x128xf32>
    %cst_32 = arith.constant dense<0.000000e+00> : vector<4x128xf32>
    %90 = vector.multi_reduction <add>, %89, %cst_32 [1] : vector<4x16x128xf32> to vector<4x128xf32>
    %91 = arith.mulf %89, %89 : vector<4x16x128xf32>
    %cst_33 = arith.constant dense<0.000000e+00> : vector<4x128xf32>
    %92 = vector.multi_reduction <add>, %91, %cst_33 [1] : vector<4x16x128xf32> to vector<4x128xf32>
    %93 = tpu.concatenate %90, %92 in 0 : vector<4x128xf32>, vector<4x128xf32> -> vector<8x128xf32>
    %cst_34 = arith.constant dense<0.000000e+00> : vector<8x128xf32>
    %94 = tpu.matmul %93, %4, %cst_34 {dimension_numbers = #tpu.dot_dimension_numbers<[1], [0], [0], [1], [0, 0, 1, 1], [], []>} : vector<8x128xf32>, vector<128x128xf32>, vector<8x128xf32> -> vector<8x128xf32>
    %95 = vector.extract_strided_slice %94 {offsets = [0, 0], sizes = [4, 128], strides = [1, 1]} : vector<8x128xf32> to vector<4x128xf32>
    %96 = vector.extract_strided_slice %94 {offsets = [4, 0], sizes = [4, 128], strides = [1, 1]} : vector<8x128xf32> to vector<4x128xf32>
    %97 = arith.mulf %95, %95 : vector<4x128xf32>
    %98 = arith.subf %96, %97 : vector<4x128xf32>
    %cst_35 = arith.constant 0.000000e+00 : f32
    %99 = vector.broadcast %cst_35 : f32 to vector<4x128xf32>
    %100 = arith.maximumf %98, %99 : vector<4x128xf32>
    %cst_36 = arith.constant 9.99999974E-6 : f32
    %101 = vector.broadcast %cst_36 : f32 to vector<4x128xf32>
    %102 = arith.addf %100, %101 : vector<4x128xf32>
    %103 = math.rsqrt %102 : vector<4x128xf32>
    %104 = vector.broadcast %87 : vector<1x128xf32> to vector<4x128xf32>
    %105 = arith.mulf %103, %104 : vector<4x128xf32>
    %106 = arith.mulf %95, %105 : vector<4x128xf32>
    %107 = vector.broadcast %88 : vector<1x128xf32> to vector<4x128xf32>
    %108 = arith.subf %107, %106 : vector<4x128xf32>
    %109 = vector.shape_cast %105 : vector<4x128xf32> to vector<4x1x128xf32>
    %110 = vector.broadcast %109 : vector<4x1x128xf32> to vector<4x16x128xf32>
    %111 = arith.mulf %89, %110 : vector<4x16x128xf32>
    %112 = vector.shape_cast %108 : vector<4x128xf32> to vector<4x1x128xf32>
    %113 = vector.broadcast %112 : vector<4x1x128xf32> to vector<4x16x128xf32>
    %114 = arith.addf %111, %113 : vector<4x16x128xf32>
    %115 = vector.shape_cast %114 : vector<4x16x128xf32> to vector<64x128xf32>
    %c0_37 = arith.constant 0 : index
    %c0_38 = arith.constant 0 : index
    %116 = vector.load %arg10[%c0_37, %c0_38] : memref<64x128xf32, #tpu.memory_space<vmem>>, vector<64x128xf32>
    tpu.vector_store %arg10[%c0_37, %c0_38], %115 {strides = array<i32>} : memref<64x128xf32, #tpu.memory_space<vmem>>, vector<64x128xf32>,
    return
  }
  func.func @transform_0(%arg0: i32) -> (i32, i32) {
    %c0_i32 = arith.constant 0 : i32
    %c0_i32_0 = arith.constant 0 : i32
    return %arg0, %c0_i32 : i32, i32
  }
  func.func @transform_1(%arg0: i32) -> (i32, i32) {
    %c0_i32 = arith.constant 0 : i32
    %c0_i32_0 = arith.constant 0 : i32
    return %arg0, %c0_i32 : i32, i32
  }
  func.func @transform_2(%arg0: i32) -> (i32, i32) {
    %c0_i32 = arith.constant 0 : i32
    %c0_i32_0 = arith.constant 0 : i32
    %c0_i32_1 = arith.constant 0 : i32
    return %c0_i32, %c0_i32_0 : i32, i32
  }
  func.func @transform_3(%arg0: i32) -> (i32, i32) {
    %c0_i32 = arith.constant 0 : i32
    %c0_i32_0 = arith.constant 0 : i32
    %c0_i32_1 = arith.constant 0 : i32
    return %c0_i32, %c0_i32_0 : i32, i32
  }
  func.func @transform_4(%arg0: i32) -> (i32, i32) {
    %c0_i32 = arith.constant 0 : i32
    %c0_i32_0 = arith.constant 0 : i32
    %c0_i32_1 = arith.constant 0 : i32
    return %c0_i32, %c0_i32_0 : i32, i32
  }
  func.func @transform_5(%arg0: i32) -> (i32, i32) {
    %c0_i32 = arith.constant 0 : i32
    %c0_i32_0 = arith.constant 0 : i32
    %c0_i32_1 = arith.constant 0 : i32
    return %c0_i32, %c0_i32_0 : i32, i32
  }
  func.func @transform_6(%arg0: i32) -> (i32, i32) {
    %c0_i32 = arith.constant 0 : i32
    %c0_i32_0 = arith.constant 0 : i32
    %c0_i32_1 = arith.constant 0 : i32
    return %c0_i32, %c0_i32_0 : i32, i32
  }
  func.func @transform_7(%arg0: i32) -> (i32, i32) {
    %c0_i32 = arith.constant 0 : i32
    %c0_i32_0 = arith.constant 0 : i32
    %c0_i32_1 = arith.constant 0 : i32
    return %c0_i32, %c0_i32_0 : i32, i32
  }
  func.func @transform_8(%arg0: i32) -> (i32, i32) {
    %c0_i32 = arith.constant 0 : i32
    %c0_i32_0 = arith.constant 0 : i32
    %c0_i32_1 = arith.constant 0 : i32
    return %c0_i32, %c0_i32_0 : i32, i32
  }
  func.func @transform_9(%arg0: i32) -> (i32, i32) {
    %c0_i32 = arith.constant 0 : i32
    %c0_i32_0 = arith.constant 0 : i32
    return %arg0, %c0_i32 : i32, i32
  }
}

</mosaic_0001>

<bundles_post_ra>
// kernel: tpu_custom_call.1
= control target key start
LH: loop header
LB: loop body
LE: loop exit
PB: predicated region body
PF: predicated region fallthrough
CT: control target
= control target key end

     0   :  { %s5083_s0 = inlined_call_operand.hbm [shape: f32[128,128], index: 0, kind: input, shape index: {}]   ;;  %s5084_s1 = inlined_call_operand.hbm [shape: f32[128,128], index: 1, kind: input, shape index: {}]   ;;  %s5085_s2 = inlined_call_operand.vmem [shape: bf16[128,64], index: 2, kind: input, shape index: {}]   ;;  %s5086_s3 = inlined_call_operand.hbm [shape: bf16[384,256], index: 3, kind: input, shape index: {}]   ;;  %s5087_s4 = inlined_call_operand.hbm [shape: bf16[768,128], index: 4, kind: input, shape index: {}]   ;;  %s5088_s5 = inlined_call_operand.vmem [shape: f32[2,256], index: 5, kind: input, shape index: {}]   ;;  %s5089_s6 = inlined_call_operand.vmem [shape: f32[4,128], index: 6, kind: input, shape index: {}]   ;;  %s5090_s7 = inlined_call_operand.hbm [shape: f32[256,256], index: 7, kind: input, shape index: {}]   ;;  %s5091_s8 = inlined_call_operand.hbm [shape: f32[128,128], index: 8, kind: input, shape index: {}]   ;;  %s5092_s9 = inlined_call_operand.hbm [shape: f32[128,128], index: 9, kind: output, shape index: {}]  }
   0x1   :  { %5102 = sst [smem:[#allocation23_spill]] %s5086_s3 }
   0x2   :  { %5103 = sst [smem:[#allocation24_spill]] %s5087_s4 }
   0x3   :  { %5104 = sst [smem:[#allocation25_spill]] %s5090_s7 }
   0x4   :  { %5105 = sst [smem:[#allocation26_spill]] %s5091_s8 }
   0x5   :  { %14 = vsyncpa [#allocation3], 0 }
   0x6   :  { %16 = vsyncpa [#allocation3 + $0x1], 0 }
   0x7   :  { %17 = vsyncpa [#allocation6], 0 }
   0x8   :  { %19 = vsyncpa [#allocation6 + $0x1], 0 }
   0x9   :  { %20 = vsyncpa [#allocation9], 0 }
   0xa   :  { %21 = vsyncpa [#allocation12], 0 }
   0xb   :  { %22 = vsyncpa [#allocation4], 0 }
   0xc   :  { %24 = vsyncpa [#allocation4 + $0x1], 0  ;;  %s4234_s30 = smov 0   ;;  %s4236_s10 = smov 0  }
   0xd   :  { %s4238_s11 = smov 0   ;;  %s4240_s12 = smov 0  }
   0xe LB: > { %5106 = sst [smem:[#allocation20_spill]] %s4150_s30  ;;  %s4255_s13 = sadd.s32 4294967295, %s4162_s12   ;;  %s4162_s12 = sphi %s4240_s12, %s5139_s12   ;;  %s4158_s11 = sphi %s4238_s11, %s5138_s11   ;;  %s4154_s10 = sphi %s4236_s10, %s5137_s10   ;;  %s4150_s30 = sphi %s4234_s30, %s5136_s30  }
   0xf   : > { %s3114_s14 = sadd.s32 4294967294, %s4162_s12   ;;  %p50_p0 = scmp.ne.s32.totalorder %s4154_s10, %s4150_s30 }
  0x10   : > { %p5093_p1 = scmp.eq.s32.totalorder %s4255_s13, 0  ;;  %p253_p3 = scmp.eq.s32.totalorder %s3114_s14, 1 }
  0x11   : > { %p3115_p5 = scmp.ge.s32.totalorder %s4162_s12, 1  ;;  %p260_p7 = scmp.lt.s32.totalorder %s4162_s12, 3 }
  0x12   : > { %p4264_p4 = por %p5093_p1, %p50_p0  ;;  %p4269_p6 = por %p253_p3, %p50_p0 }
  0x13   : > { %p4274_p8 = pnand %p3115_p5, %p260_p7  ;;  %s4164_s18 = smov [#allocation7]  }
  0x14   : > { %s5107_s15 = scalar_select %p4264_p4, 1, 0 }
  0x15   : > { %s5108_s16 = scalar_select %p4269_p6, 1, 0 }
  0x16   : > { %s5110_s17 = scalar_select %p4274_p8, 1, 0 }
  0x17   : > { %5109 = sst [smem:[#allocation21_spill]] %s5108_s16  ;;  %s275_s19 = sshll.u32 %s4164_s18, 4  ;;  %s4278_s19 = int_to_ptr.vmem [resolvable:$true] %s275_s19 }
  0x18   : > { %p3673_p9 = pneg %p4274_p8  ;;  %s4165_s21 = smov [#allocation8]  }
  0x19   : > { %s288_s22 = sshll.u32 %s4165_s21, 4  ;;  %s5112_s3 = sld [smem:[#allocation23_spill]]  ;;  %s4289_s22 = int_to_ptr.vmem [resolvable:$true] %s288_s22 }
  0x1a   : > { %p4285_p11 = pnand %p3673_p9, %p5093_p1 }
  0x1c   : > { %p4299_p13 = pneg %p4285_p11 }
  0x1f   : > { %s3908_s25 = scalar_lea.hbm %s5112_s3, 6144 }
  0x20   : > { %p3909_p12 = scmp.ne.s32.totalorder %s5112_s3, %s3908_s25  ;;  %p3915_p5 = scmp.lt.u32.totalorder %s3908_s25, %s5112_s3 }
  0x22   : > { %p3911_p0 = pnand %p4299_p13, %p3909_p12 }
  0x24   : > { %p3912_p3 = pneg %p3911_p0 }
  0x26   : > { %p3917_p7 = pnand %p3915_p5, %p3912_p3 }
  0x28   : > { %3920 = shalt.err (!%p3917_p7)
}
  0x29   : > { %s3921_s18 = scalar_lea.vmem %s4278_s19, 6144  ;;  %p3929_p2 = scmp.lt.s32.totalorder %s4278_s19, %s4278_s19 }
  0x2a   : > { %p3922_p9 = scmp.ne.s32.totalorder %s4278_s19, %s3921_s18  ;;  %p3930_p6 = scmp.lt.s32.totalorder %s3921_s18, %s3921_s18 }
  0x2c   : > { %p3924_p10 = pnand %p3922_p9, %p4299_p13  ;;  %p3931_p12 = por %p3930_p6, %p3929_p2 }
  0x2e   : > { %p3925_p1 = pneg %p3924_p10 }
  0x30   : > { %p3932_p0 = pnand %p3931_p12, %p3925_p1 }
  0x32   : > { %3935 = shalt.err (!%p3932_p0)
}
  0x33   : > { %s5096_s21 = smov 128   ;;  %s5098_s23 = smov 8  }
  0x34   : > { %3676 = dma.hbm_to_vmem [thread:$0]  (!%p4285_p11), %s5112_s3, 6144, %s4278_s19, [#allocation6], %s5096_s21, %s5096_s21, %s5098_s23  }
  0x35   : > { %s5114_s4 = sld [smem:[#allocation24_spill]] }
  0x3b   : > { %s3936_s29 = scalar_lea.hbm %s5114_s4, 6144 }
  0x3c   : > { %p3937_p1 = scmp.ne.s32.totalorder %s5114_s4, %s3936_s29  ;;  %p3943_p10 = scmp.lt.u32.totalorder %s3936_s29, %s5114_s4 }
  0x3e   : > { %p3939_p2 = pnand %p3937_p1, %p4299_p13 }
  0x40   : > { %p3940_p6 = pneg %p3939_p2 }
  0x42   : > { %p3945_p3 = pnand %p3943_p10, %p3940_p6 }
  0x44   : > { %3948 = shalt.err (!%p3945_p3)
}
  0x45   : > { %s3949_s19 = scalar_lea.vmem %s4289_s22, 6144  ;;  %p3957_p12 = scmp.lt.s32.totalorder %s4289_s22, %s4289_s22 }
  0x46   : > { %p3950_p5 = scmp.ne.s32.totalorder %s4289_s22, %s3949_s19  ;;  %p3958_p0 = scmp.lt.s32.totalorder %s3949_s19, %s3949_s19 }
  0x48   : > { %p3952_p7 = pnand %p3950_p5, %p4299_p13  ;;  %p3959_p1 = por %p3958_p0, %p3957_p12 }
  0x4a   : > { %p3953_p9 = pneg %p3952_p7 }
  0x4c   : > { %p3960_p2 = pnand %p3959_p1, %p3953_p9 }
  0x4e   : > { %3963 = shalt.err (!%p3960_p2)
}
  0x4f   : > { %s4168_s24 = smov 64   ;;  %s4169_s30 = smov 4  }
  0x50   : > { %3679 = dma.hbm_to_vmem [thread:$0]  (!%p4285_p11), %s5114_s4, 6144, %s4289_s22, [#allocation9], %s4168_s24, %s4168_s24, %s4169_s30  }
  0x51   : > { %s4170_s26 = smov [#allocation10]   ;;  %s5115_s7 = sld [smem:[#allocation25_spill]] }
  0x52   : > { %s307_s27 = sshll.u32 %s4170_s26, 4  ;;  %s308_s27 = int_to_ptr.vmem [resolvable:$true] %s307_s27 }
  0x57   : > { %s3964_s18 = scalar_lea.hbm %s5115_s7, 8192 }
  0x58   : > { %p3965_p6 = scmp.ne.s32.totalorder %s5115_s7, %s3964_s18  ;;  %p3971_p5 = scmp.lt.u32.totalorder %s3964_s18, %s5115_s7 }
  0x5a   : > { %p3967_p10 = pnand %p3965_p6, %p4299_p13 }
  0x5c   : > { %p3968_p3 = pneg %p3967_p10 }
  0x5e   : > { %p3973_p7 = pnand %p3971_p5, %p3968_p3 }
  0x60   : > { %3976 = shalt.err (!%p3973_p7)
}
  0x61   : > { %s3977_s22 = scalar_lea.vmem %s308_s27, 8192  ;;  %p3985_p1 = scmp.lt.s32.totalorder %s308_s27, %s308_s27 }
  0x62   : > { %p3978_p9 = scmp.ne.s32.totalorder %s308_s27, %s3977_s22  ;;  %p3986_p2 = scmp.lt.s32.totalorder %s3977_s22, %s3977_s22 }
  0x64   : > { %p3980_p12 = pnand %p3978_p9, %p4299_p13  ;;  %p3987_p4 = por %p3986_p2, %p3985_p1 }
  0x66   : > { %p3981_p0 = pneg %p3980_p12 }
  0x68   : > { %p3988_p8 = pnand %p3987_p4, %p3981_p0 }
  0x6a   : > { %3991 = shalt.err (!%p3988_p8)
}
  0x6b   : > { %s4171_s21 = smov 256   ;;  %s4172_s24 = smov 16  }
  0x6c   : > { %3682 = dma.hbm_to_vmem [thread:$0]  (!%p4285_p11), %s5115_s7, 8192, %s308_s27, [#allocation9], %s4171_s21, %s4171_s21, %s4172_s24  }
  0x6d   : > { %s4173_s30 = smov [#allocation11]   ;;  %s5116_s8 = sld [smem:[#allocation26_spill]] }
  0x6e   : > { %s320_s16 = sshll.u32 %s4173_s30, 4  ;;  %s321_s16 = int_to_ptr.vmem [resolvable:$true] %s320_s16 }
  0x73   : > { %s3992_s29 = scalar_lea.hbm %s5116_s8, 2048 }
  0x74   : > { %p3993_p4 = scmp.ne.s32.totalorder %s5116_s8, %s3992_s29  ;;  %p3999_p10 = scmp.lt.u32.totalorder %s3992_s29, %s5116_s8 }
  0x76   : > { %p3995_p8 = pnand %p3993_p4, %p4299_p13 }
  0x78   : > { %p3996_p6 = pneg %p3995_p8 }
  0x7a   : > { %p4001_p3 = pnand %p3999_p10, %p3996_p6 }
  0x7c   : > { %4004 = shalt.err (!%p4001_p3)
}
  0x7d   : > { %s4005_s27 = scalar_lea.vmem %s321_s16, 2048  ;;  %p4013_p12 = scmp.lt.s32.totalorder %s321_s16, %s321_s16 }
  0x7e   : > { %p4006_p5 = scmp.ne.s32.totalorder %s321_s16, %s4005_s27  ;;  %p4014_p0 = scmp.lt.s32.totalorder %s4005_s27, %s4005_s27 }
  0x80   : > { %p4008_p7 = pnand %p4006_p5, %p4299_p13  ;;  %p4015_p1 = por %p4014_p0, %p4013_p12 }
  0x82   : > { %p4009_p9 = pneg %p4008_p7 }
  0x84   : > { %p4016_p2 = pnand %p4015_p1, %p4009_p9 }
  0x86   : > { %4019 = shalt.err (!%p4016_p2)
}
  0x87   : > { %s5117_s21 = smov 8   ;;  %s5118_s24 = smov 128  }
  0x88   : > { %3685 = dma.hbm_to_vmem [thread:$0]  (!%p4285_p11), %s5116_s8, 2048, %s321_s16, [#allocation12], %s5118_s24, %s5118_s24, %s5117_s21  }
  0x89   : > { %s4386_s28 = sadd.s32 1, %s4162_s12   ;;  %s37_s20 = sadd.s32 1, %s4158_s11 }
  0x8a   : > { %s34_s30 = ssub.s32 %s4162_s12, %s4386_s28  ;;  %p44_p13 = scmp.ne.s32.totalorder %s4158_s11, %s4154_s10 }
  0x8b   : > { %p35_p4 = scmp.eq.s32.totalorder %s34_s30, 0  ;;  %p45_p8 = scmp.eq.s32.totalorder %s4162_s12, 0 }
  0x8c   : > { %p5119_p6 = scmp.eq.s32.totalorder %s4255_s13, 1  ;;  %p3701_p3 = scmp.lt.s32.totalorder %s4162_s12, 2 }
  0x8d   : > { %s4402_s26 = scalar_select %p35_p4, %s4158_s11, %s37_s20  }
  0x8e   : > { %p4396_p10 = por %p5119_p6, %p44_p13  ;;  %p46_p5 = por %p45_p8, %p44_p13 }
  0x8f   : > { %5121 = sst [smem:[#allocation22_spill]] %s4402_s26  ;;  %s334_s29 = sand.u32 1, %s4158_s11  }
  0x90   : > { %s3121_s14 = sshll.u32 %s334_s29, 6  ;;  %s3260_s16 = sshll.u32 %s4162_s12, 10 }
  0x91   : > { %s4409_s22 = scalar_lea.hbm %s5083_s0, %s3260_s16  ;;  %s338_s27 = scalar_lea.vmem [#allocation2], %s3121_s14 }
  0x92   : > { %s345_s3 = sshll.u32 %s338_s27, 4  ;;  %p4413_p11 = pnand %p3701_p3, %p46_p5  ;;  %s4411_s3 = int_to_ptr.vmem [resolvable:$true] %s345_s3 }
  0x93   : > { %s4420_s18 = scalar_lea.hbm %s5084_s1, %s3260_s16  ;;  %s359_s19 = scalar_lea.vmem [#allocation5], %s3121_s14 }
  0x94   : > { %s4422_s4 = sshll.u32 %s359_s19, 4  ;;  %s4424_s7 = scalar_lea.sflag [#allocation3], %s334_s29  ;;  %s4456_s4 = int_to_ptr.vmem [resolvable:$true] %s4422_s4 }
  0x95   : > { %s4020_s27 = scalar_lea.hbm %s4409_s22, 1024  ;;  %p4022_p9 = pneg %p4413_p11 }
  0x96   : > { %p4021_p7 = scmp.ne.s32.totalorder %s4409_s22, %s4020_s27  ;;  %s4025_s20 = scalar_lea.hbm %s5083_s0, 2048 }
  0x97   : > { %p4026_p1 = scmp.lt.u32.totalorder %s4409_s22, %s5083_s0  ;;  %p4027_p2 = scmp.lt.u32.totalorder %s4025_s20, %s4020_s27 }
  0x98   : > { %p4023_p12 = pnand %p4022_p9, %p4021_p7  ;;  %p4029_p4 = scmp.lt.u32.totalorder %s4020_s27, %s4409_s22 }
  0x99   : > { %p4028_p13 = por %p4027_p2, %p4026_p1 }
  0x9a   : > { %p4024_p0 = pneg %p4023_p12 }
  0x9b   : > { %p4030_p8 = por %p4029_p4, %p4028_p13 }
  0x9d   : > { %p4031_p6 = pnand %p4030_p8, %p4024_p0 }
  0x9f   : > { %4034 = shalt.err (!%p4031_p6)
}
  0xa0   : > { %s4035_s29 = scalar_lea.vmem %s4411_s3, 1024  ;;  %s4174_s8 = smov [#allocation2]  }
  0xa1   : > { %p4036_p3 = scmp.ne.s32.totalorder %s4411_s3, %s4035_s29  ;;  %s4040_s26 = sshll.u32 %s4174_s8, 4  ;;  %s4041_s26 = int_to_ptr.vmem [resolvable:$false] %s4040_s26 }
  0xa2   : > { %s4042_s14 = scalar_lea.vmem %s4041_s26, 2048  ;;  %p4043_p12 = scmp.lt.s32.totalorder %s4411_s3, %s4041_s26 }
  0xa3   : > { %p4038_p5 = pnand %p4036_p3, %p4022_p9  ;;  %p4044_p1 = scmp.lt.s32.totalorder %s4042_s14, %s4035_s29 }
  0xa5   : > { %p4039_p7 = pneg %p4038_p5  ;;  %p4045_p2 = por %p4044_p1, %p4043_p12 }
  0xa7   : > { %p4046_p13 = pnand %p4045_p2, %p4039_p7 }
  0xa9   : > { %4049 = shalt.err (!%p4046_p13)
}
  0xaa   : > { %3689 = dma.hbm_to_vmem [thread:$0]  (!%p4413_p11), %s4409_s22, 1024, %s4411_s3, %s4424_s7, %s5118_s24, %s5118_s24, %s5117_s21  }
  0xab   : > { %s355_s19 = sand.u32 1, %s4162_s12   ;;  %s4050_s20 = scalar_lea.hbm %s4420_s18, 1024 }
  0xac   : > { %s4459_s27 = scalar_lea.sflag [#allocation6], %s355_s19  ;;  %p4051_p0 = scmp.ne.s32.totalorder %s4420_s18, %s4050_s20 }
  0xad   : > { %s4055_s29 = scalar_lea.hbm %s5084_s1, 2048  ;;  %p4056_p6 = scmp.lt.u32.totalorder %s4420_s18, %s5084_s1 }
  0xae   : > { %p4053_p4 = pnand %p4051_p0, %p4022_p9  ;;  %p4057_p3 = scmp.lt.u32.totalorder %s4055_s29, %s4050_s20 }
  0xaf   : > { %p4059_p7 = scmp.lt.u32.totalorder %s4050_s20, %s4420_s18 }
  0xb0   : > { %p4054_p8 = pneg %p4053_p4  ;;  %p4058_p5 = por %p4057_p3, %p4056_p6 }
  0xb2   : > { %p4060_p12 = por %p4059_p7, %p4058_p5 }
  0xb4   : > { %p4061_p1 = pnand %p4060_p12, %p4054_p8 }
  0xb6   : > { %4064 = shalt.err (!%p4061_p1)
}
  0xb7   : > { %s4065_s7 = scalar_lea.vmem %s4456_s4, 1024  ;;  %s4175_s22 = smov [#allocation5]  }
  0xb8   : > { %p4066_p2 = scmp.ne.s32.totalorder %s4456_s4, %s4065_s7  ;;  %s4070_s3 = sshll.u32 %s4175_s22, 4  ;;  %s4071_s3 = int_to_ptr.vmem [resolvable:$false] %s4070_s3 }
  0xb9   : > { %s4072_s14 = scalar_lea.vmem %s4071_s3, 2048  ;;  %p4073_p4 = scmp.lt.s32.totalorder %s4456_s4, %s4071_s3 }
  0xba   : > { %p4068_p13 = pnand %p4066_p2, %p4022_p9  ;;  %p4074_p6 = scmp.lt.s32.totalorder %s4072_s14, %s4065_s7 }
  0xbc   : > { %p4069_p0 = pneg %p4068_p13  ;;  %p4075_p3 = por %p4074_p6, %p4073_p4 }
  0xbe   : > { %p4076_p5 = pnand %p4075_p3, %p4069_p0 }
  0xc0   : > { %4079 = shalt.err (!%p4076_p5)
}
  0xc1   : > { %3692 = dma.hbm_to_vmem [thread:$0]  (!%p4413_p11), %s4420_s18, 1024, %s4456_s4, %s4459_s27, %s5118_s24, %s5118_s24, %s5117_s21  }
  0xc2   : > { %p5123_p9 = scmp.ne.s32.totalorder %s5110_s17, 0 }
  0xc3   : > { %s4491_s19 = sand.u32 (!%p5123_p9), 1, %s4154_s10   ;;  %p5124_p8 = scmp.ne.s32.totalorder (!%p5123_p9), %s5107_s15, 0 }
  0xc4   : > { %378 = sbr.rel (%p5123_p9) target bundleno = 2073 (0x819), region = 56  ;;  %s4494_s20 = sshll.u32 (!%p5123_p9), %s4491_s19, 6 }
  0xc5   : > { %s381_s23 = scalar_lea.sflag (!%p5123_p9), [#allocation3], %s4491_s19  ;;  %s4498_s30 = scalar_lea.vmem (!%p5123_p9), [#allocation2], %s4494_s20 }
  0xcb   : > { %4125 = dma.done.wait (%p5124_p8), %s381_s23, 1024  }
  0xcc   : > { %4127 = vsyncadd (%p5124_p8), %s381_s23, 4294966272  ;;  %s389_s4 = sand.u32 1, %s4255_s13   ;;  %s4506_s21 = scalar_lea.vmem [#allocation5], %s4494_s20 }
  0xcd   : > { %s390_s17 = scalar_lea.sflag [#allocation6], %s389_s4 }
  0xce   : > { %4129 = dma.done.wait (%p5124_p8), %s390_s17, 1024  }
  0xcf   : > { %4131 = vsyncadd (%p5124_p8), %s390_s17, 4294966272  ;;  %p5125_p11 = scmp.eq.s32.totalorder %s4255_s13, 0 }
  0xd1   : > { %4133 = dma.done.wait (%p5125_p11), [#allocation6], 6144   ;;  %p5126_p7 = pmov %p5125_p11 }
  0xd3   : > { %4135 = vsyncadd (%p5126_p7), [#allocation6], 4294961152  ;;  %p5127_p12 = pmov %p5126_p7 }
  0xd4   : > { %p5128_p1 = pmov %p5126_p7 }
  0xd5   : > { %4137 = dma.done.wait (%p5127_p12), [#allocation9], 14336  }
  0xd6   : > { %4139 = vsyncadd (%p5128_p1), [#allocation9], 4294952960  ;;  %p5129_p2 = pmov %p5128_p1 }
  0xd7   : > { %p5130_p13 = pmov %p5128_p1 }
  0xd8   : > { %4141 = dma.done.wait (%p5129_p2), [#allocation12], 2048  }
  0xd9   : > { %4143 = vsyncadd (%p5130_p13), [#allocation12], 4294965248  ;;  %v453_v0 = vld [vmem:[%s4498_s30] sm:$0xff]  ;;  %v454_v1 = vld [vmem:[%s4498_s30 + $0x8] sm:$0xff]  ;;  %vm659_vm0 = vcmask 523264   ;;  %vm1346_vm1 = vcmask 1045509  }
  0xda   : > { %v455_v2 = vld [vmem:[%s4498_s30 + $0x10] sm:$0xff]  ;;  %v615_v3 = vpack.c.bf16 %v454_v1, %v453_v0  ;;  %v456_v4 = vld [vmem:[%s4498_s30 + $0x18] sm:$0xff]  ;;  %v457_v6 = vld [vmem:[%s4498_s30 + $0x20] sm:$0xff]  ;;  %vm1327_vm2 = vcmask 1041409   ;;  %vm1348_vm3 = vcmask 1046534   ;;  %vm1329_vm4 = vcmask 1042434  }
  0xdb   : > { %v4528_v5 = vpack.c.bf16 %v456_v4, %v455_v2  ;;  %v458_v7 = vld [vmem:[%s4498_s30 + $0x28] sm:$0xff]  ;;  %v3756_v8 = vld [vmem:[%s5085_s2] sm:$0xff]   ;;  %v459_v10 = vld [vmem:[%s4498_s30 + $0x30] sm:$0xff]  ;;  %vm1350_vm5 = vcmask 1047559   ;;  %vm1331_vm6 = vcmask 1043459   ;;  %vm1357_vm7 = vcmask 1043456  }
  0xdc   : > { %3429 = vmatprep.subr.bf16.mxu0 %v615_v3  ;;  %1061 = vmatprep.mubr.bf16.mxu1 %v615_v3  ;;  %v4536_v9 = vpack.c.bf16 %v458_v7, %v457_v6  ;;  %v460_v11 = vld [vmem:[%s4498_s30 + $0x38] sm:$0xff]  ;;  %v3764_v13 = vld [vmem:[#allocation7 + $0x4] ss:$8 sps:$4 sm:$0xff]   ;;  %v3766_v14 = vld [vmem:[#allocation7] ss:$8 sps:$4 sm:$0xff]   ;;  %vm4179_vm8 = vmmov 0  }
  0xdd   : > { %3430 = vmatpush3.bf16.msra.mxu0 %v615_v3  ;;  %3437 = vmatprep.mubr.msk.bf16.mxu0 %vm659_vm0, %v3756_v8  ;;  %v4543_v12 = vpack.c.bf16 %v460_v11, %v459_v10  ;;  %v3767_v15 = vld [vmem:[#allocation7 + $0x14] ss:$8 sps:$4 sm:$0xff]   ;;  %v3769_v16 = vld [vmem:[#allocation7 + $0x10] ss:$8 sps:$4 sm:$0xff]   ;;  %v3757_v17 = vld [vmem:[%s5085_s2 + $0x8] sm:$0xff]   ;;  %s448_s29 = scalar_lea.vmem [#allocation13], %s4494_s20 }
  0xde   : > { %3431 = vmatprep.subr.bf16.mxu0 %v4528_v5  ;;  %1029 = vmatprep.subr.bf16.mxu1 %v3764_v13  ;;  %v3770_v18 = vld [vmem:[#allocation7 + $0x24] ss:$8 sps:$4 sm:$0xff]   ;;  %v3758_v19 = vld [vmem:[%s5085_s2 + $0x10] sm:$0xff]   ;;  %v3772_v20 = vld [vmem:[#allocation7 + $0x20] ss:$8 sps:$4 sm:$0xff]   ;;  %s2980_s8 = sshll.u32 %s448_s29, 4  ;;  %s5039_s8 = int_to_ptr.vmem [resolvable:$true] %s2980_s8 }
  0xdf   : > { %1030 = vmatpush1.bf16.msra.mxu1 %v3766_v14  ;;  %v3773_v21 = vld [vmem:[#allocation7 + $0x34] ss:$8 sps:$4 sm:$0xff]   ;;  %v3775_v22 = vld [vmem:[#allocation7 + $0x30] ss:$8 sps:$4 sm:$0xff]   ;;  %v3776_v24 = vld [vmem:[#allocation7 + $0x44] ss:$8 sps:$4 sm:$0xff]  }
  0xe0   : > { %1031 = vmatprep.subr.bf16.mxu1 %v3767_v15  ;;  %v3759_v23 = vld [vmem:[%s5085_s2 + $0x18] sm:$0xff]   ;;  %v3760_v25 = vld [vmem:[%s5085_s2 + $0x20] sm:$0xff]   ;;  %v3761_v28 = vld [vmem:[%s5085_s2 + $0x28] sm:$0xff]   ;;  %s2967_s7 = scalar_lea.sflag [#allocation4], %s4491_s19  ;;  %s4080_s22 = scalar_lea.vmem %s5039_s8, 1024 }
  0xe1   : > { %3432 = vmatpush3.bf16.msra.mxu0 %v4528_v5  ;;  %v3778_v26 = vld [vmem:[#allocation7 + $0x40] ss:$8 sps:$4 sm:$0xff]   ;;  %v3779_v27 = vld [vmem:[#allocation7 + $0x54] ss:$8 sps:$4 sm:$0xff]   ;;  %v3781_v30 = vld [vmem:[#allocation7 + $0x50] ss:$8 sps:$4 sm:$0xff]   ;;  %p4081_p0 = scmp.ne.s32.totalorder %s5039_s8, %s4080_s22 }
  0xe2   : > { %3433 = vmatprep.subr.bf16.mxu0 %v4536_v9  ;;  %v3762_v29 = vld [vmem:[%s5085_s2 + $0x30] sm:$0xff]   ;;  %v3782_v31 = vld [vmem:[#allocation7 + $0x64] ss:$8 sps:$4 sm:$0xff]   ;;  %v3784_v32 = vld [vmem:[#allocation7 + $0x60] ss:$8 sps:$4 sm:$0xff]   ;;  %s4181_s3 = smov [#allocation13]  }
  0xe3   : > { %1032 = vmatpush1.bf16.msra.mxu1 %v3769_v16  ;;  %v3785_v33 = vld [vmem:[#allocation7 + $0x74] ss:$8 sps:$4 sm:$0xff]   ;;  %v3787_v34 = vld [vmem:[#allocation7 + $0x70] ss:$8 sps:$4 sm:$0xff]   ;;  %v3788_v36 = vld [vmem:[#allocation7 + $0x84] ss:$8 sps:$4 sm:$0xff]   ;;  %p4082_p4 = pnand %p4081_p0, %p4396_p10 }
  0xe4   : > { %1033 = vmatprep.subr.bf16.mxu1 %v3770_v18  ;;  %v3763_v35 = vld [vmem:[%s5085_s2 + $0x38] sm:$0xff]   ;;  %v3790_v37 = vld [vmem:[#allocation7 + $0x80] ss:$8 sps:$4 sm:$0xff]   ;;  %v3794_v40 = vld [vmem:[#allocation7 + $0xa4] ss:$8 sps:$4 sm:$0xff]   ;;  %s4084_s14 = sshll.u32 %s4181_s3, 4  ;;  %s4085_s14 = int_to_ptr.vmem [resolvable:$false] %s4084_s14 }
  0xe5   : > { %3434 = vmatpush3.bf16.msra.mxu0 %v4536_v9  ;;  %v3791_v38 = vld [vmem:[#allocation7 + $0x94] ss:$8 sps:$4 sm:$0xff]   ;;  %v3793_v39 = vld [vmem:[#allocation7 + $0x90] ss:$8 sps:$4 sm:$0xff]   ;;  %v3796_v41 = vld [vmem:[#allocation7 + $0xa0] ss:$8 sps:$4 sm:$0xff]   ;;  %p4083_p6 = pneg %p4082_p4  ;;  %p4087_p3 = scmp.lt.s32.totalorder %s5039_s8, %s4085_s14 }
  0xe6   : > { %3435 = vmatprep.subr.bf16.mxu0 %v4543_v12  ;;  %v3797_v42 = vld [vmem:[#allocation7 + $0xb4] ss:$8 sps:$4 sm:$0xff]   ;;  %v3799_v43 = vld [vmem:[#allocation7 + $0xb0] ss:$8 sps:$4 sm:$0xff]   ;;  %v3800_v44 = vld [vmem:[#allocation7 + $0xc4] ss:$8 sps:$4 sm:$0xff]  }
  0xe7   : > { %1034 = vmatpush1.bf16.msra.mxu1 %v3772_v20  ;;  %v3802_v45 = vld [vmem:[#allocation7 + $0xc0] ss:$8 sps:$4 sm:$0xff]   ;;  %v3803_v46 = vld [vmem:[#allocation7 + $0xd4] ss:$8 sps:$4 sm:$0xff]   ;;  %v3805_v47 = vld [vmem:[#allocation7 + $0xd0] ss:$8 sps:$4 sm:$0xff]  }
  0xe8   : > { %1035 = vmatprep.subr.bf16.mxu1 %v3773_v21  ;;  %v3806_v48 = vld [vmem:[#allocation7 + $0xe4] ss:$8 sps:$4 sm:$0xff]   ;;  %v3808_v49 = vld [vmem:[#allocation7 + $0xe0] ss:$8 sps:$4 sm:$0xff]   ;;  %v3809_v50 = vld [vmem:[#allocation7 + $0xf4] ss:$8 sps:$4 sm:$0xff]  }
  0xe9   : > { %3436 = vmatpush3.bf16.msra.mxu0 %v4543_v12  ;;  %v3811_v51 = vld [vmem:[#allocation7 + $0xf0] ss:$8 sps:$4 sm:$0xff]   ;;  %v3814_v52 = vld [vmem:[#allocation7 + $0x104] ss:$8 sps:$4 sm:$0xff]   ;;  %v3812_v21 = vld [vmem:[#allocation7 + $0x100] ss:$8 sps:$4 sm:$0xff]  }
  0xea   : > { %v486_v53 = vld [vmem:[#allocation10 + $0x8] sm:$0xff]  ;;  %v488_v54 = vld [vmem:[#allocation10 + $0x18] sm:$0xff]  ;;  %v485_v55 = vld [vmem:[#allocation10] sm:$0xff]  ;;  %s4086_s23 = scalar_lea.vmem %s4085_s14, 2048 }
  0xeb   : > { %1036 = vmatpush1.bf16.msra.mxu1 %v3775_v22  ;;  %v3523_v56 = vpack.c.bf16 %v488_v54, %v486_v53  ;;  %v487_v57 = vld [vmem:[#allocation10 + $0x10] sm:$0xff]  ;;  %v490_v58 = vld [vmem:[#allocation10 + $0x28] sm:$0xff]  ;;  %v492_v59 = vld [vmem:[#allocation10 + $0x38] sm:$0xff]  ;;  %v4176_v53 = vmov 0   ;;  %p4088_p5 = scmp.lt.s32.totalorder %s4086_s23, %s4080_s22 }
  0xec   : > { %3438 = vmatmul.mubr.msk.bf16.vlgmr.msra.gmra.mrb[0].mxu0 %vm659_vm0, %v3757_v17  ;;  %1037 = vmatprep.subr.bf16.mxu1 %v3776_v24  ;;  %v3525_v60 = vpack.c.bf16 %v487_v57, %v485_v55  ;;  %v3527_v61 = vpack.c.bf16 %v492_v59, %v490_v58  ;;  %v489_v62 = vld [vmem:[#allocation10 + $0x20] sm:$0xff]  ;;  %v491_v63 = vld [vmem:[#allocation10 + $0x30] sm:$0xff]  ;;  %v494_v0 = vld [vmem:[#allocation10 + $0x48] sm:$0xff] }
  0xed   : > { %3441 = vmatprep.mubr.msk.bf16.mxu0 %vm659_vm0, %v3758_v19  ;;  %3524 = vmatprep.subr.bf16.mxu0 %v3523_v56  ;;  %v496_v1 = vld [vmem:[#allocation10 + $0x58] sm:$0xff]  ;;  %v3529_v2 = vpack.c.bf16 %v491_v63, %v489_v62  ;;  %v493_v4 = vld [vmem:[#allocation10 + $0x40] sm:$0xff]  ;;  %v495_v6 = vld [vmem:[#allocation10 + $0x50] sm:$0xff]  ;;  %p4089_p9 = por %p4088_p5, %p4087_p3 }
  0xee   : > { %3526 = vmatpush1.bf16.msra.mxu0 %v3525_v60  ;;  %v3531_v3 = vpack.c.bf16 %v496_v1, %v494_v0  ;;  %v498_v7 = vld [vmem:[#allocation10 + $0x68] sm:$0xff]  ;;  %v500_v8 = vld [vmem:[#allocation10 + $0x78] sm:$0xff]  ;;  %v3533_v10 = vpack.c.bf16 %v495_v6, %v493_v4  ;;  %v497_v13 = vld [vmem:[#allocation10 + $0x60] sm:$0xff] }
  0xef   : > { %1038 = vmatpush1.bf16.msra.mxu1 %v3778_v26  ;;  %3528 = vmatprep.subr.bf16.mxu0 %v3527_v61  ;;  %v3535_v11 = vpack.c.bf16 %v500_v8, %v498_v7  ;;  %v499_v14 = vld [vmem:[#allocation10 + $0x70] sm:$0xff]  ;;  %v3820_v26 = vld [vmem:[#allocation7 + $0x124] ss:$8 sps:$4 sm:$0xff]   ;;  %v504_v54 = vld [vmem:[#allocation10 + $0x98] sm:$0xff]  ;;  %p4090_p8 = pnand %p4089_p9, %p4083_p6 }
  0xf0   : > { %1039 = vmatprep.subr.bf16.mxu1 %v3779_v27  ;;  %v3537_v15 = vpack.c.bf16 %v499_v14, %v497_v13  ;;  %v3815_v24 = vld [vmem:[#allocation7 + $0x110] ss:$8 sps:$4 sm:$0xff]   ;;  %v501_v56 = vld [vmem:[#allocation10 + $0x80] sm:$0xff]  ;;  %v506_v59 = vld [vmem:[#allocation10 + $0xa8] sm:$0xff] }
  0xf1   : > { %v503_v57 = vld [vmem:[#allocation10 + $0x90] sm:$0xff]  ;;  %v508_v60 = vld [vmem:[#allocation10 + $0xb8] sm:$0xff]  ;;  %v505_v62 = vld [vmem:[#allocation10 + $0xa0] sm:$0xff] }
  0xf2   : > { %3530 = vmatpush1.bf16.msra.mxu0 %v3529_v2  ;;  %v3541_v58 = vpack.c.bf16 %v503_v57, %v501_v56  ;;  %v3543_v61 = vpack.c.bf16 %v508_v60, %v506_v59  ;;  %v507_v63 = vld [vmem:[#allocation10 + $0xb0] sm:$0xff]  ;;  %v510_v1 = vld [vmem:[#allocation10 + $0xc8] sm:$0xff]  ;;  %v512_v2 = vld [vmem:[#allocation10 + $0xd8] sm:$0xff] }
  0xf3   : > { %1040 = vmatpush1.bf16.msra.mxu1 %v3781_v30  ;;  %3532 = vmatprep.subr.bf16.mxu0 %v3531_v3  ;;  %v3545_v0 = vpack.c.bf16 %v507_v63, %v505_v62  ;;  %v3547_v3 = vpack.c.bf16 %v512_v2, %v510_v1  ;;  %v509_v4 = vld [vmem:[#allocation10 + $0xc0] sm:$0xff]  ;;  %v511_v6 = vld [vmem:[#allocation10 + $0xd0] sm:$0xff]  ;;  %v514_v8 = vld [vmem:[#allocation10 + $0xe8] sm:$0xff] }
  0xf4   : > { %3442 = vmatmul.mubr.msk.bf16.gmra.mrb[4].mxu0 %vm659_vm0, %v3759_v23  ;;  %1041 = vmatprep.subr.bf16.mxu1 %v3782_v31  ;;  %v3817_v23 = vld [vmem:[#allocation7 + $0x114] ss:$8 sps:$4 sm:$0xff]   ;;  %v3549_v7 = vpack.c.bf16 %v511_v6, %v509_v4  ;;  %v513_v13 = vld [vmem:[#allocation10 + $0xe0] sm:$0xff]  ;;  %v546_v56 = vld [vmem:[#allocation10 + $0x1e8] sm:$0xff] }
  0xf5   : > { %3445 = vmatprep.mubr.msk.bf16.mxu0 %vm659_vm0, %v3760_v25  ;;  %v515_v14 = vld [vmem:[#allocation10 + $0xf0] sm:$0xff]  ;;  %v548_v57 = vld [vmem:[#allocation10 + $0x1f8] sm:$0xff] }
  0xf6   : > { %3534 = vmatpush1.bf16.msra.mxu0 %v3533_v10  ;;  %v516_v10 = vld [vmem:[#allocation10 + $0xf8] sm:$0xff]  ;;  %v3583_v59 = vpack.c.bf16 %v548_v57, %v546_v56  ;;  %v547_v60 = vld [vmem:[#allocation10 + $0x1f0] sm:$0xff] }
  0xf7   : > { %1042 = vmatpush1.bf16.msra.mxu1 %v3784_v32  ;;  %3536 = vmatprep.subr.bf16.mxu0 %v3535_v11  ;;  %v3551_v11 = vpack.c.bf16 %v516_v10, %v514_v8 }
  0xf8   : > { %1043 = vmatprep.subr.bf16.mxu1 %v3785_v33  ;;  %v3823_v33 = vld [vmem:[#allocation7 + $0x134] ss:$8 sps:$4 sm:$0xff]  }
  0xfa   : > { %3538 = vmatpush1.bf16.msra.mxu0 %v3537_v15  ;;  %v3553_v15 = vpack.c.bf16 %v515_v14, %v513_v13 }
  0xfb   : > { %1044 = vmatpush1.bf16.msra.mxu1 %v3787_v34  ;;  %v3821_v34 = vld [vmem:[#allocation7 + $0x130] ss:$8 sps:$4 sm:$0xff]  }
  0xfc   : > { %3446 = vmatmul.mubr.msk.bf16.gmra.mrb[8].mxu0 %vm659_vm0, %v3761_v28  ;;  %1045 = vmatprep.subr.bf16.mxu1 %v3788_v36 }
  0xfd   : > { %3449 = vmatprep.mubr.msk.bf16.mxu0 %vm659_vm0, %v3762_v29  ;;  %v3818_v29 = vld [vmem:[#allocation7 + $0x120] ss:$8 sps:$4 sm:$0xff]  }
  0xff   : > { %1046 = vmatpush1.bf16.msra.mxu1 %v3790_v37 }
 0x100   : > { %1047 = vmatprep.subr.bf16.mxu1 %v3791_v38  ;;  %v3824_v38 = vld [vmem:[#allocation7 + $0x140] ss:$8 sps:$4 sm:$0xff]  }
 0x103   : > { %1048 = vmatpush1.bf16.msra.mxu1 %v3793_v39 }
 0x104   : > { %3450 = vmatmul.mubr.msk.bf16.gmra.mrb[12].mxu0 %vm659_vm0, %v3763_v35  ;;  %1049 = vmatprep.subr.bf16.mxu1 %v3794_v40  ;;  %v3826_v35 = vld [vmem:[#allocation7 + $0x144] ss:$8 sps:$4 sm:$0xff]  }
 0x107   : > { %1050 = vmatpush1.bf16.msra.mxu1 %v3796_v41  ;;  %v3829_v41 = vld [vmem:[#allocation7 + $0x154] ss:$8 sps:$4 sm:$0xff]  }
 0x108   : > { %1051 = vmatprep.subr.bf16.mxu1 %v3797_v42 }
 0x10b   : > { %1052 = vmatpush1.bf16.msra.mxu1 %v3799_v43  ;;  %v3827_v43 = vld [vmem:[#allocation7 + $0x150] ss:$8 sps:$4 sm:$0xff]  }
 0x10c   : > { %1053 = vmatprep.subr.bf16.mxu1 %v3800_v44  ;;  %v3832_v44 = vld [vmem:[#allocation7 + $0x164] ss:$8 sps:$4 sm:$0xff]  }
 0x10f   : > { %1054 = vmatpush1.bf16.msra.mxu1 %v3802_v45 }
 0x110   : > { %1055 = vmatprep.subr.bf16.mxu1 %v3803_v46 }
 0x113   : > { %1056 = vmatpush1.bf16.msra.mxu1 %v3805_v47  ;;  %v3830_v47 = vld [vmem:[#allocation7 + $0x160] ss:$8 sps:$4 sm:$0xff]  }
 0x114   : > { %1057 = vmatprep.subr.bf16.mxu1 %v3806_v48 }
 0x117   : > { %1058 = vmatpush1.bf16.msra.mxu1 %v3808_v49 }
 0x118   : > { %1059 = vmatprep.subr.bf16.mxu1 %v3809_v50  ;;  %v3835_v50 = vld [vmem:[#allocation7 + $0x174] ss:$8 sps:$4 sm:$0xff]  }
 0x11b   : > { %1060 = vmatpush1.bf16.msra.mxu1 %v3811_v51 }
 0x11c   : > { %1102 = vmatprep.subr.bf16.mxu1 %v3814_v52  ;;  %v3833_v52 = vld [vmem:[#allocation7 + $0x170] ss:$8 sps:$4 sm:$0xff]  }
 0x1bf   : > { %v3439_v16 = vpop.f32.mrb[0].mxu0 }
 0x1c0   : > { %v718_v17 = vpop.f32.mrb[1].mxu0 }
 0x1c1   : > { %v3440_v18 = vpop.f32.mrb[2].mxu0 }
 0x1c2   : > { %v782_v19 = vpack.c.bf16 %v3440_v18, %v3439_v16  ;;  %v721_v20 = vpop.f32.mrb[3].mxu0  ;;  %v518_v16 = vld [vmem:[#allocation10 + $0x108] sm:$0xff] }
 0x1c3   : > { %v781_v22 = vpack.c.bf16 %v721_v20, %v718_v17  ;;  %v520_v17 = vld [vmem:[#allocation10 + $0x118] sm:$0xff]  ;;  %v519_v20 = vld [vmem:[#allocation10 + $0x110] sm:$0xff] }
 0x1c4   : > { %v3555_v18 = vpack.c.bf16 %v520_v17, %v518_v16 }
 0x1c5   : > { %1062 = vmatmul.mubr.bf16.vlgmr.msra.gmra.mrb[0].mxu1 %v781_v22  ;;  %v522_v22 = vld [vmem:[#allocation10 + $0x128] sm:$0xff] }
 0x1c6   : > { %1103 = vmatpush1.bf16.msra.mxu1 %v3812_v21  ;;  %1071 = vmatprep.mubr.bf16.mxu1 %v4528_v5 }
 0x1c7   : > { %1104 = vmatprep.subr.bf16.mxu1 %v3817_v23  ;;  %v3443_v25 = vpop.f32.mrb[4].mxu0  ;;  %v524_v23 = vld [vmem:[#allocation10 + $0x138] sm:$0xff] }
 0x1c8   : > { %v734_v27 = vpop.f32.mrb[5].mxu0 }
 0x1c9   : > { %v3444_v28 = vpop.f32.mrb[6].mxu0 }
 0x1ca   : > { %1105 = vmatpush1.bf16.msra.mxu1 %v3815_v24  ;;  %v784_v30 = vpack.c.bf16 %v3444_v28, %v3443_v25  ;;  %v737_v31 = vpop.f32.mrb[7].mxu0  ;;  %v3559_v24 = vpack.c.bf16 %v524_v23, %v522_v22  ;;  %v521_v25 = vld [vmem:[#allocation10 + $0x120] sm:$0xff]  ;;  %v526_v28 = vld [vmem:[#allocation10 + $0x148] sm:$0xff] }
 0x1cb   : > { %1106 = vmatprep.subr.bf16.mxu1 %v3820_v26  ;;  %v783_v32 = vpack.c.bf16 %v737_v31, %v734_v27  ;;  %v523_v26 = vld [vmem:[#allocation10 + $0x130] sm:$0xff]  ;;  %v525_v31 = vld [vmem:[#allocation10 + $0x140] sm:$0xff] }
 0x1cc   : > { %v3561_v27 = vpack.c.bf16 %v523_v26, %v521_v25 }
 0x1cd   : > { %1072 = vmatmul.mubr.bf16.gmra.mrb[4].mxu1 %v782_v19  ;;  %v517_v19 = vld [vmem:[#allocation10 + $0x100] sm:$0xff] }
 0x1ce   : > { %1107 = vmatpush1.bf16.msra.mxu1 %v3818_v29  ;;  %1081 = vmatprep.mubr.bf16.mxu1 %v4536_v9  ;;  %v3557_v21 = vpack.c.bf16 %v519_v20, %v517_v19  ;;  %v528_v29 = vld [vmem:[#allocation10 + $0x158] sm:$0xff] }
 0x1cf   : > { %1108 = vmatprep.subr.bf16.mxu1 %v3823_v33  ;;  %v3447_v5 = vpop.f32.mrb[8].mxu0 }
 0x1d0   : > { %v750_v36 = vpop.f32.mrb[9].mxu0 }
 0x1d1   : > { %v3448_v37 = vpop.f32.mrb[10].mxu0 }
 0x1d2   : > { %1109 = vmatpush1.bf16.msra.mxu1 %v3821_v34  ;;  %v786_v39 = vpack.c.bf16 %v3448_v37, %v3447_v5  ;;  %v753_v40 = vpop.f32.mrb[11].mxu0  ;;  %v530_v34 = vld [vmem:[#allocation10 + $0x168] sm:$0xff]  ;;  %v531_v37 = vld [vmem:[#allocation10 + $0x170] sm:$0xff] }
 0x1d3   : > { %1110 = vmatprep.subr.bf16.mxu1 %v3826_v35  ;;  %v785_v42 = vpack.c.bf16 %v753_v40, %v750_v36  ;;  %v532_v35 = vld [vmem:[#allocation10 + $0x178] sm:$0xff]  ;;  %v529_v36 = vld [vmem:[#allocation10 + $0x160] sm:$0xff] }
 0x1d4   : > { %v3567_v5 = vpack.c.bf16 %v532_v35, %v530_v34  ;;  %v536_v40 = vld [vmem:[#allocation10 + $0x198] sm:$0xff] }
 0x1d5   : > { %1082 = vmatmul.mubr.bf16.gmra.mrb[8].mxu1 %v783_v32  ;;  %v527_v32 = vld [vmem:[#allocation10 + $0x150] sm:$0xff] }
 0x1d6   : > { %1111 = vmatpush1.bf16.msra.mxu1 %v3824_v38  ;;  %1091 = vmatprep.mubr.bf16.mxu1 %v4543_v12  ;;  %v502_v12 = vld [vmem:[#allocation10 + $0x88] sm:$0xff]  ;;  %v3565_v33 = vpack.c.bf16 %v527_v32, %v525_v31  ;;  %v3569_v38 = vpack.c.bf16 %v531_v37, %v529_v36 }
 0x1d7   : > { %1112 = vmatprep.subr.bf16.mxu1 %v3829_v41  ;;  %v3451_v9 = vpop.f32.mrb[12].mxu0  ;;  %v3539_v55 = vpack.c.bf16 %v504_v54, %v502_v12  ;;  %v541_v12 = vld [vmem:[#allocation10 + $0x1c0] sm:$0xff]  ;;  %v543_v54 = vld [vmem:[#allocation10 + $0x1d0] sm:$0xff] }
 0x1d8   : > { %v766_v45 = vpop.f32.mrb[13].mxu0 }
 0x1d9   : > { %v3452_v46 = vpop.f32.mrb[14].mxu0  ;;  %3540 = vmatprep.subr.bf16.mxu0 %v3539_v55  ;;  %v3581_v55 = vpack.c.bf16 %v543_v54, %v541_v12 }
 0x1da   : > { %1113 = vmatpush1.bf16.msra.mxu1 %v3827_v43  ;;  %v788_v48 = vpack.c.bf16 %v3452_v46, %v3451_v9  ;;  %v769_v49 = vpop.f32.mrb[15].mxu0  ;;  %3542 = vmatpush1.bf16.msra.mxu0 %v3541_v58  ;;  %v535_v43 = vld [vmem:[#allocation10 + $0x190] sm:$0xff]  ;;  %v538_v9 = vld [vmem:[#allocation10 + $0x1a8] sm:$0xff]  ;;  %v545_v58 = vld [vmem:[#allocation10 + $0x1e0] sm:$0xff] }
 0x1db   : > { %1114 = vmatprep.subr.bf16.mxu1 %v3832_v44  ;;  %v787_v51 = vpack.c.bf16 %v769_v49, %v766_v45  ;;  %3544 = vmatprep.subr.bf16.mxu0 %v3543_v61  ;;  %v540_v45 = vld [vmem:[#allocation10 + $0x1b8] sm:$0xff]  ;;  %v3585_v61 = vpack.c.bf16 %v547_v60, %v545_v58 }
 0x1dc   : > { %v3575_v46 = vpack.c.bf16 %v540_v45, %v538_v9 }
 0x1dd   : > { %1092 = vmatmul.mubr.bf16.gmra.mrb[12].mxu1 %v784_v30  ;;  %v3563_v30 = vpack.c.bf16 %v528_v29, %v526_v28 }
 0x1de   : > { %1115 = vmatpush1.bf16.msra.mxu1 %v3830_v47  ;;  %1134 = vmatprep.mubr.bf16.mxu1 %v4176_v53  ;;  %v537_v47 = vld [vmem:[#allocation10 + $0x1a0] sm:$0xff] }
 0x1df   : > { %1116 = vmatprep.subr.bf16.mxu1 %v3835_v50  ;;  %3546 = vmatpush1.bf16.msra.mxu0 %v3545_v0  ;;  %v542_v50 = vld [vmem:[#allocation10 + $0x1c8] sm:$0xff] }
 0x1e0   : > { %3548 = vmatprep.subr.bf16.mxu0 %v3547_v3 }
 0x1e2   : > { %1117 = vmatpush1.bf16.msra.mxu1 %v3833_v52 }
 0x1e3   : > { %3550 = vmatpush1.bf16.msra.mxu0 %v3549_v7 }
 0x1e4   : > { %3552 = vmatprep.subr.bf16.mxu0 %v3551_v11 }
 0x1e5   : > { %1135 = vmatmul.mubr.bf16.vlgmr.msra.gmra.mrb[0].mxu1 %v785_v42  ;;  %v533_v42 = vld [vmem:[#allocation10 + $0x180] sm:$0xff] }
 0x1e6   : > { %1144 = vmatprep.mubr.bf16.mxu1 %v4176_v53  ;;  %v3573_v44 = vpack.c.bf16 %v535_v43, %v533_v42 }
 0x1e7   : > { %3554 = vmatpush1.bf16.msra.mxu0 %v3553_v15 }
 0x1e8   : > { %3556 = vmatprep.subr.bf16.mxu0 %v3555_v18 }
 0x1eb   : > { %3558 = vmatpush1.bf16.msra.mxu0 %v3557_v21 }
 0x1ec   : > { %3560 = vmatprep.subr.bf16.mxu0 %v3559_v24 }
 0x1ed   : > { %1145 = vmatmul.mubr.bf16.gmra.mrb[4].mxu1 %v786_v39  ;;  %v534_v39 = vld [vmem:[#allocation10 + $0x188] sm:$0xff] }
 0x1ee   : > { %1154 = vmatprep.mubr.bf16.mxu1 %v4176_v53  ;;  %v3571_v41 = vpack.c.bf16 %v536_v40, %v534_v39 }
 0x1ef   : > { %3562 = vmatpush1.bf16.msra.mxu0 %v3561_v27 }
 0x1f0   : > { %3564 = vmatprep.subr.bf16.mxu0 %v3563_v30 }
 0x1f3   : > { %3566 = vmatpush1.bf16.msra.mxu0 %v3565_v33 }
 0x1f4   : > { %3568 = vmatprep.subr.bf16.mxu0 %v3567_v5 }
 0x1f5   : > { %1155 = vmatmul.mubr.bf16.gmra.mrb[8].mxu1 %v787_v51  ;;  %v544_v51 = vld [vmem:[#allocation10 + $0x1d8] sm:$0xff] }
 0x1f6   : > { %1164 = vmatprep.mubr.bf16.mxu1 %v4176_v53  ;;  %v3579_v52 = vpack.c.bf16 %v544_v51, %v542_v50 }
 0x1f7   : > { %3570 = vmatpush1.bf16.msra.mxu0 %v3569_v38 }
 0x1f8   : > { %3572 = vmatprep.subr.bf16.mxu0 %v3571_v41 }
 0x1fb   : > { %3574 = vmatpush1.bf16.msra.mxu0 %v3573_v44 }
 0x1fc   : > { %3576 = vmatprep.subr.bf16.mxu0 %v3575_v46 }
 0x1fd   : > { %1165 = vmatmul.mubr.bf16.gmra.mrb[12].mxu1 %v788_v48  ;;  %v539_v48 = vld [vmem:[#allocation10 + $0x1b0] sm:$0xff] }
 0x1fe   : > { %v3577_v49 = vpack.c.bf16 %v539_v48, %v537_v47 }
 0x200   : > { %3578 = vmatpush1.bf16.msra.mxu0 %v3577_v49 }
 0x201   : > { %3580 = vmatprep.subr.bf16.mxu0 %v3579_v52 }
 0x204   : > { %3582 = vmatpush1.bf16.msra.mxu0 %v3581_v55 }
 0x205   : > { %3584 = vmatprep.subr.bf16.mxu0 %v3583_v59 }
 0x208   : > { %3586 = vmatpush1.bf16.msra.mxu0 %v3585_v61 }
 0x2b8   : > { %v1136_v62 = vpop.f32.mrb[0].mxu1 }
 0x2b9   : > { %v4583_v63 = vmax.f32 %v1136_v62, 0.0  ;;  %v1138_v0 = vpop.f32.mrb[1].mxu1 }
 0x2ba   : > { %v4585_v1 = vmax.f32 %v1138_v0, 0.0  ;;  %v1140_v2 = vpop.f32.mrb[2].mxu1 }
 0x2bb   : > { %v4587_v3 = vmax.f32 %v1140_v2, 0.0  ;;  %v1142_v4 = vpop.f32.mrb[3].mxu1  ;;  %v1247_v7 = vmul.f32 %v4583_v63, %v4583_v63 }
 0x2bc   : > { %v4589_v6 = vmax.f32 %v1142_v4, 0.0  ;;  %v1248_v11 = vmul.f32 %v4585_v1, %v4585_v1 }
 0x2bd   : > { %v1191_v8 = vadd.f32 %v4587_v3, %v4583_v63  ;;  %v1249_v10 = vmul.f32 %v4587_v3, %v4587_v3 }
 0x2be   : > { %v1198_v13 = vadd.f32 %v4589_v6, %v4585_v1  ;;  %v1250_v14 = vmul.f32 %v4589_v6, %v4589_v6 }
 0x2bf   : > { %v1192_v15 = vrot.slane %v1191_v8, 4  ;;  %v1263_v16 = vadd.f32 %v1249_v10, %v1247_v7 }
 0x2c0   : > { %v1199_v17 = vrot.slane %v1198_v13, 4  ;;  %v1270_v18 = vadd.f32 %v1250_v14, %v1248_v11  ;;  %v1146_v19 = vpop.f32.mrb[4].mxu1 }
 0x2c1   : > { %v1193_v20 = vadd.f32 %v1192_v15, %v1191_v8  ;;  %v1148_v21 = vpop.f32.mrb[5].mxu1  ;;  %v1264_v22 = vrot.slane %v1263_v16, 4  ;;  %v4603_v26 = vmax.f32 %v1146_v19, 0.0 }
 0x2c2   : > { %v1200_v23 = vadd.f32 %v1199_v17, %v1198_v13  ;;  %v1271_v24 = vrot.slane %v1270_v18, 4  ;;  %v1150_v25 = vpop.f32.mrb[6].mxu1  ;;  %v4605_v27 = vmax.f32 %v1148_v21, 0.0 }
 0x2c3   : > { %v4607_v28 = vmax.f32 %v1150_v25, 0.0  ;;  %v1152_v29 = vpop.f32.mrb[7].mxu1  ;;  %v1194_v31 = vrot.slane %v1193_v20, 2  ;;  %v1265_v34 = vadd.f32 %v1264_v22, %v1263_v16  ;;  %v1251_v37 = vmul.f32 %v4603_v26, %v4603_v26 }
 0x2c4   : > { %v4609_v30 = vmax.f32 %v1152_v29, 0.0  ;;  %v1201_v35 = vrot.slane %v1200_v23, 2  ;;  %v1272_v5 = vadd.f32 %v1271_v24, %v1270_v18  ;;  %v1252_v38 = vmul.f32 %v4605_v27, %v4605_v27 }
 0x2c5   : > { %v1205_v32 = vadd.f32 %v4607_v28, %v4603_v26  ;;  %v1253_v33 = vmul.f32 %v4607_v28, %v4607_v28  ;;  %v4623_v42 = vadd.f32 %v1194_v31, %v1193_v20  ;;  %v1266_v45 = vrot.slane %v1265_v34, 2 }
 0x2c6   : > { %v1254_v36 = vmul.f32 %v4609_v30, %v4609_v30  ;;  %v1212_v39 = vadd.f32 %v4609_v30, %v4605_v27  ;;  %v1202_v46 = vadd.f32 %v1201_v35, %v1200_v23  ;;  %v1273_v47 = vrot.slane %v1272_v5, 2 }
 0x2c7   : > { %v1206_v40 = vrot.slane %v1205_v32, 4  ;;  %v1277_v43 = vadd.f32 %v1253_v33, %v1251_v37  ;;  %v1196_v55 = vrot.slane %v4623_v42, 1  ;;  %v4634_v59 = vadd.f32 %v1266_v45, %v1265_v34 }
 0x2c8   : > { %v1156_v41 = vpop.f32.mrb[8].mxu1  ;;  %v1284_v44 = vadd.f32 %v1254_v36, %v1252_v38  ;;  %v1213_v49 = vrot.slane %v1212_v39, 4  ;;  %v1203_v60 = vrot.slane %v1202_v46, 1  ;;  %v4636_v61 = vadd.f32 %v1273_v47, %v1272_v5 }
 0x2c9   : > { %v1158_v9 = vpop.f32.mrb[9].mxu1  ;;  %v4625_v50 = vmax.f32 %v1156_v41, 0.0  ;;  %v1207_v52 = vadd.f32 %v1206_v40, %v1205_v32  ;;  %v1278_v56 = vrot.slane %v1277_v43, 4  ;;  %v1268_v20 = vrot.slane %v4634_v59, 1 }
 0x2ca   : > { %v1160_v48 = vpop.f32.mrb[10].mxu1  ;;  %v4627_v12 = vmax.f32 %v1158_v9, 0.0  ;;  %v1285_v57 = vrot.slane %v1284_v44, 4  ;;  %v1214_v0 = vadd.f32 %v1213_v49, %v1212_v39  ;;  %v4651_v21 = vadd.f32 %v1203_v60, %v1202_v46 }
 0x2cb   : > { %v1162_v51 = vpop.f32.mrb[11].mxu1  ;;  %v4629_v54 = vmax.f32 %v1160_v48, 0.0  ;;  %v1255_v2 = vmul.f32 %v4625_v50, %v4625_v50  ;;  %v1208_v8 = vrot.slane %v1207_v52, 2  ;;  %v1279_v15 = vadd.f32 %v1278_v56, %v1277_v43 }
 0x2cc   : > { %v4632_v58 = vmax.f32 %v1162_v51, 0.0  ;;  %v1256_v10 = vmul.f32 %v4627_v12, %v4627_v12  ;;  %v1286_v16 = vadd.f32 %v1285_v57, %v1284_v44  ;;  %v1215_v25 = vrot.slane %v1214_v0, 2 }
 0x2cd   : > { %v1219_v62 = vadd.f32 %v4629_v54, %v4625_v50  ;;  %v1257_v4 = vmul.f32 %v4629_v54, %v4629_v54  ;;  %v4655_v34 = vadd.f32 %v1208_v8, %v1207_v52  ;;  %v1280_v37 = vrot.slane %v1279_v15, 2 }
 0x2ce   : > { %v1226_v7 = vadd.f32 %v4632_v58, %v4627_v12  ;;  %v1258_v13 = vmul.f32 %v4632_v58, %v4632_v58  ;;  %v1287_v38 = vrot.slane %v1286_v16, 2  ;;  %v1216_v60 = vadd.f32 %v1215_v25, %v1214_v0 }
 0x2cf   : > { %v1220_v11 = vrot.slane %v1219_v62, 4  ;;  %v1291_v17 = vadd.f32 %v1257_v4, %v1255_v2  ;;  %v1281_v57 = vadd.f32 %v1280_v37, %v1279_v15 }
 0x2d0   : > { %v1166_v14 = vpop.f32.mrb[12].mxu1  ;;  %v1227_v18 = vrot.slane %v1226_v7, 4  ;;  %v1298_v23 = vadd.f32 %v1258_v13, %v1256_v10  ;;  %v1288_v4 = vadd.f32 %v1287_v38, %v1286_v16  ;;  %v1217_v15 = vrot.slane %v1216_v60, 1 }
 0x2d1   : > { %v1168_v19 = vpop.f32.mrb[13].mxu1  ;;  %v1221_v22 = vadd.f32 %v1220_v11, %v1219_v62  ;;  %v1292_v29 = vrot.slane %v1291_v17, 4  ;;  %v4653_v32 = vmax.f32 %v1166_v14, 0.0  ;;  %v1282_v0 = vrot.slane %v1281_v57, 1 }
 0x2d2   : > { %v1170_v24 = vpop.f32.mrb[14].mxu1  ;;  %v1228_v31 = vadd.f32 %v1227_v18, %v1226_v7  ;;  %v1299_v35 = vrot.slane %v1298_v23, 4  ;;  %v4657_v5 = vmax.f32 %v1168_v19, 0.0  ;;  %v1210_v18 = vrot.slane %v4655_v34, 1 }
 0x2d3   : > { %v1172_v33 = vpop.f32.mrb[15].mxu1  ;;  %v4659_v36 = vmax.f32 %v1170_v24, 0.0  ;;  %v1293_v39 = vadd.f32 %v1292_v29, %v1291_v17  ;;  %v1222_v41 = vrot.slane %v1221_v22, 2  ;;  %v1259_v46 = vmul.f32 %v4653_v32, %v4653_v32 }
 0x2d4   : > { %v4661_v40 = vmax.f32 %v1172_v33, 0.0  ;;  %v1229_v43 = vrot.slane %v1228_v31, 2  ;;  %v1300_v44 = vadd.f32 %v1299_v35, %v1298_v23  ;;  %v1260_v51 = vmul.f32 %v4657_v5, %v4657_v5 }
 0x2d5   : > { %v1233_v9 = vadd.f32 %v4659_v36, %v4653_v32  ;;  %v1294_v45 = vrot.slane %v1293_v39, 2  ;;  %v1261_v47 = vmul.f32 %v4659_v36, %v4659_v36  ;;  %v1223_v19 = vadd.f32 %v1222_v41, %v1221_v22 }
 0x2d6   : > { %v1240_v48 = vadd.f32 %v4661_v40, %v4657_v5  ;;  %v1301_v49 = vrot.slane %v1300_v44, 2  ;;  %v1262_v56 = vmul.f32 %v4661_v40, %v4661_v40  ;;  %v1230_v11 = vadd.f32 %v1229_v43, %v1228_v31 }
 0x2d7   : > { %v1234_v52 = vrot.slane %v1233_v9, 4  ;;  %v1305_v62 = vadd.f32 %v1261_v47, %v1259_v46  ;;  %v1295_v7 = vadd.f32 %v1294_v45, %v1293_v39  ;;  %v1289_v29 = vrot.slane %v1288_v4, 1 }
 0x2d8   : > { %v1241_v2 = vrot.slane %v1240_v48, 4  ;;  %v1312_v10 = vadd.f32 %v1262_v56, %v1260_v51  ;;  %v1302_v13 = vadd.f32 %v1301_v49, %v1300_v44  ;;  %v1231_v37 = vrot.slane %v1230_v11, 1 }
 0x2d9   : > { %v1235_v8 = vadd.f32 %v1234_v52, %v1233_v9  ;;  %v1306_v14 = vrot.slane %v1305_v62, 4  ;;  %v1296_v33 = vrot.slane %v1295_v7, 1  ;;  %v1269_v22 = vadd.f32 %v1268_v20, %v4634_v59 }
 0x2da   : > { %v1242_v17 = vadd.f32 %v1241_v2, %v1240_v48  ;;  %v1313_v24 = vrot.slane %v1312_v10, 4  ;;  %v1303_v43 = vrot.slane %v1302_v13, 1  ;;  %v1275_v41 = vrot.slane %v4636_v61, 1 }
 0x2db   : > { %v1236_v23 = vrot.slane %v1235_v8, 2  ;;  %v1307_v16 = vadd.f32 %v1306_v14, %v1305_v62  ;;  %v1224_v44 = vrot.slane %v1223_v19, 1  ;;  %v1283_v45 = vadd.f32 %v1282_v0, %v1281_v57 }
 0x2dc   : > { %v1243_v25 = vrot.slane %v1242_v17, 2  ;;  %v1314_v35 = vadd.f32 %v1313_v24, %v1312_v10  ;;  %v1218_v49 = vadd.f32 %v1217_v15, %v1216_v60  ;;  %v1297_v51 = vadd.f32 %v1296_v33, %v1295_v7 }
 0x2dd   : > { %v1237_v31 = vadd.f32 %v1236_v23, %v1235_v8  ;;  %v1308_v38 = vrot.slane %v1307_v16, 2  ;;  %v1290_v52 = vadd.f32 %v1289_v29, %v1288_v4  ;;  %v1211_v62 = vadd.f32 %v1210_v18, %v4655_v34 }
 0x2de   : > { %v1244_v39 = vadd.f32 %v1243_v25, %v1242_v17  ;;  %v1315_v9 = vrot.slane %v1314_v35, 2  ;;  %v1232_v8 = vadd.f32 %v1231_v37, %v1230_v11  ;;  %v1304_v10 = vadd.f32 %v1303_v43, %v1302_v13 }
 0x2df   : > { %v1238_v46 = vrot.slane %v1237_v31, 1  ;;  %v1309_v47 = vadd.f32 %v1308_v38, %v1307_v16  ;;  %v1225_v14 = vadd.f32 %v1224_v44, %v1223_v19  ;;  %v1276_v59 = vadd.f32 %v1275_v41, %v4636_v61 }
 0x2e0   : > { %v1245_v48 = vrot.slane %v1244_v39, 1  ;;  %v1316_v56 = vadd.f32 %v1315_v9, %v1314_v35  ;;  %v1197_v57 = vadd.f32 %v1196_v55, %v4623_v42  ;;  %v1347_v60 = vsel %vm1346_vm1, %v1283_v45, %v1269_v22 }
 0x2e1   : > { %v1310_v2 = vrot.slane %v1309_v47, 1  ;;  %v1239_v23 = vadd.f32 %v1238_v46, %v1237_v31  ;;  %v1333_v34 = vsel %vm1327_vm2, %v1218_v49, %v4651_v21  ;;  %v1352_v7 = vsel %vm1346_vm1, %v1290_v52, %v1276_v59  ;;  %v3853_v59 = vld [vmem:[#allocation8] sm:$0xff]  }
 0x2e2   : > { %v1246_v17 = vadd.f32 %v1245_v48, %v1244_v39  ;;  %v1317_v20 = vrot.slane %v1316_v56, 1  ;;  %v1349_v11 = vsel %vm1348_vm3, %v1297_v51, %v1347_v60  ;;  %v1334_v13 = vsel %vm1329_vm4, %v1232_v8, %v1333_v34  ;;  %v3855_v34 = vld [vmem:[#allocation8 + $0x8] sm:$0xff]  }
 0x2e3   : > { %v1311_v24 = vadd.f32 %v1310_v2, %v1309_v47  ;;  %v1353_v61 = vsel %vm1348_vm3, %v1304_v10, %v1352_v7  ;;  %v1328_v18 = vsel %vm1327_vm2, %v1211_v62, %v1197_v57  ;;  %v1448_v31 = vlaneseq  ;;  %v565_v47 = vld [vmem:[%s5088_s5] sm:$0xf] }
 0x2e4   : > { %v1318_v4 = vadd.f32 %v1317_v20, %v1316_v56  ;;  %v1335_v55 = vsel %vm1331_vm6, %v1246_v17, %v1334_v13  ;;  %v1330_v0 = vsel %vm1329_vm4, %v1225_v14, %v1328_v18  ;;  %v4177_v51 = vmov 1966171168   ;;  %v3852_v17 = vld [vmem:[#allocation8 + $0x40] sm:$0xff]   ;;  %v3854_v20 = vld [vmem:[#allocation8 + $0x48] sm:$0xff]   ;;  %v3856_v13 = vld [vmem:[#allocation8 + $0x50] sm:$0xff]  }
 0x2e5   : > { %v1351_v42 = vsel %vm1350_vm5, %v1311_v24, %v1349_v11  ;;  %v1332_v15 = vsel %vm1331_vm6, %v1239_v23, %v1330_v0  ;;  %v4701_v43 = vshrl.u32 %v1448_v31, 7  ;;  %v1498_v52 = vunpack.c.l.s4 %v4177_v51  ;;  %3275 = vmatprep.subr.bf16.mxu1 %v3852_v17 }
 0x2e6   : > { %v1354_v19 = vsel %vm1350_vm5, %v1318_v4, %v1353_v61  ;;  %v1358_v16 = vsel %vm1357_vm7, %v1332_v15, %v1351_v42  ;;  %3276 = vmatpush3.bf16.msra.mxu1 %v3853_v59 }
 0x2e7   : > { %v1359_v21 = vsel %vm1357_vm7, %v1335_v55, %v1354_v19  ;;  %v4704_v45 = vsub.s32 0, %v4701_v43  ;;  %v1454_v48 = vsub.s32 2, %v4701_v43  ;;  %v4714_v62 = vsub.s32 1, %v4701_v43  ;;  %3277 = vmatprep.subr.bf16.mxu1 %v3854_v20 }
 0x2e8   : > { %1424 = vmatprep.mubr.f32.mxu0 %v1359_v21  ;;  %v1482_v2 = vsub.s32 3, %v4701_v43  ;;  %v1499_v10 = vunpack.c.0.s8 %v1498_v52  ;;  %v3857_v21 = vld [vmem:[#allocation8 + $0x10] sm:$0xff]  }
 0x2e9   : > { %1425 = vmatmul.mubr.f32.vlgmr.msra.gmra.mrb[16].mxu0 %v1358_v16  ;;  %v1451_v49 = vrot.slane %v565_v47, %v4704_v45  ;;  %v1455_v56 = vrot.slane %v565_v47, %v1454_v48  ;;  %v1479_v57 = vrot.slane %v565_v47, %v4714_v62 }
 0x2ea   : > { %1796 = vmatprep.mubr.bf16.mxu0 %v4176_v53  ;;  %v1483_v24 = vrot.slane %v565_v47, %v1482_v2  ;;  %v4723_v7 = vsub.s32 %v1499_v10, %v4701_v43  ;;  %3278 = vmatpush3.bf16.msra.mxu1 %v3855_v34 }
 0x2eb   : > { %v1461_v8 = vrot.slane %v1451_v49, %v4704_v45  ;;  %v1465_v14 = vrot.slane %v1455_v56, %v4704_v45  ;;  %v1489_v18 = vrot.slane %v1479_v57, %v4714_v62  ;;  %3279 = vmatprep.subr.bf16.mxu1 %v3856_v13 }
 0x2ec   : > { %v1493_v55 = vrot.slane %v1483_v24, %v4714_v62 }
 0x2ee   : > { %3280 = vmatpush3.bf16.msra.mxu1 %v3857_v21 }
 0x3bc   : > { %v1426_v25 = vpop.f32.mrb[16].mxu0 }
 0x3bd   : > { %v1431_v29 = vmul.f32 %v1426_v25, %v1426_v25  ;;  %v1428_v33 = vpop.f32.mrb[17].mxu0 }
 0x3be   : > { %v1432_v35 = vmul.f32 %v1428_v33, %v1428_v33 }
 0x3bf   : > { %v1435_v37 = vrot.slane %v1431_v29, 4  ;;  %v3858_v29 = vld [vmem:[#allocation8 + $0x58] sm:$0xff]  }
 0x3c0   : > { %v1436_v38 = vrot.slane %v1432_v35, 4  ;;  %3281 = vmatprep.subr.bf16.mxu1 %v3858_v29 }
 0x3c1   : > { %v1439_v39 = vsub.f32 %v1426_v25, %v1435_v37 }
 0x3c2   : > { %v1440_v22 = vsub.f32 %v1428_v33, %v1436_v38 }
 0x3c3   : > { %v1441_v41 = vmax.f32 %v1439_v39, 0.0  ;;  %v3859_v39 = vld [vmem:[#allocation8 + $0x18] sm:$0xff]  }
 0x3c4   : > { %v1442_v44 = vmax.f32 %v1440_v22, 0.0  ;;  %3282 = vmatpush3.bf16.msra.mxu1 %v3859_v39 }
 0x3c5   : > { %v1443_v9 = vadd.f32 1e-05, %v1441_v41 }
 0x3c6   : > { %v1444_v46 = vadd.f32 1e-05, %v1442_v44 }
 0x3c7   : > { %3884 = vrsqrt.f32 %v1443_v9 }
 0x3c8   : > { %3886 = vrsqrt.f32 %v1444_v46 }
 0x3d1   : > { %v3885_v23 = vpop.eup %3884 }
 0x3d2   : > { %v3887_v60 = vpop.eup %3886  ;;  %v1466_v4 = vmul.f32 %v3885_v23, %v1461_v8 }
 0x3d3   : > { %v1467_v11 = vmul.f32 %v3887_v60, %v1465_v14  ;;  %v3861_v14 = vld [vmem:[#allocation8 + $0x20] sm:$0xff]  }
 0x3d4   : > { %v1470_v61 = vrot.slane %v1466_v4, 4 }
 0x3d5   : > { %v1471_v42 = vrot.slane %v1467_v11, 4  ;;  %v1496_v19 = vcombine.high %v1466_v4, %v1467_v11 }
 0x3d6   : > { %v1474_v0 = vmul.f32 %v1470_v61, %v1426_v25 }
 0x3d7   : > { %v1475_v15 = vmul.f32 %v1471_v42, %v1428_v33  ;;  %v1503_v16 = vrot.slane %v1496_v19, %v4723_v7  ;;  %v3860_v33 = vld [vmem:[#allocation8 + $0x60] sm:$0xff]  }
 0x3d8   : > { %v1494_v31 = vsub.f32 %v1489_v18, %v1474_v0  ;;  %3283 = vmatprep.subr.bf16.mxu1 %v3860_v33 }
 0x3d9   : > { %v1495_v35 = vsub.f32 %v1493_v55, %v1475_v15  ;;  %v1504_v37 = vcombine.high %v1503_v16, %v1503_v16  ;;  %v1511_v38 = vrot.slane %v1503_v16, %v4723_v7  ;;  %3284 = vmatpush3.bf16.msra.mxu1 %v3861_v14  ;;  %v3864_v15 = vld [vmem:[#allocation8 + $0x70] sm:$0xff]  }
 0x3db   : > { %v1579_v22 = vcombine.low %v1494_v31, %v1495_v35  ;;  %v1528_v41 = vrot.slane %v1511_v38, %v4714_v62  ;;  %v1524_v44 = vrot.slane %v1511_v38, %v4704_v45  ;;  %v1518_v25 = vrot.slane %v1504_v37, %v4723_v7  ;;  %v3865_v37 = vld [vmem:[#allocation8 + $0x30] sm:$0xff]  }
 0x3dc   : > { %v1519_v9 = vcombine.high %v1511_v38, %v1511_v38 }
 0x3dd   : > { %v1586_v46 = vrot.slane %v1579_v22, %v4723_v7  ;;  %v1562_v47 = vmul.f32 %v1528_v41, %v4585_v1  ;;  %v1564_v49 = vmul.f32 %v1528_v41, %v4589_v6  ;;  %v1561_v51 = vmul.f32 %v1524_v44, %v4583_v63  ;;  %v3862_v6 = vld [vmem:[#allocation8 + $0x68] sm:$0xff]  }
 0x3de   : > { %v1563_v52 = vmul.f32 %v1524_v44, %v4587_v3  ;;  %v1536_v56 = vrot.slane %v1518_v25, %v4714_v62  ;;  %v1532_v8 = vrot.slane %v1518_v25, %v4704_v45  ;;  %v1544_v10 = vrot.slane %v1519_v9, %v4714_v62  ;;  %3285 = vmatprep.subr.bf16.mxu1 %v3862_v6  ;;  %v3839_v6 = vld [vmem:[#allocation8 + $0x88] sm:$0xff]  }
 0x3df   : > { %v1587_v17 = vcombine.high %v1586_v46, %v1586_v46  ;;  %v1594_v59 = vrot.slane %v1586_v46, %v4723_v7  ;;  %v1540_v20 = vrot.slane %v1519_v9, %v4704_v45  ;;  %v1520_v1 = vcombine.high %v1518_v25, %v1518_v25 }
 0x3e0   : > { %v1566_v63 = vmul.f32 %v1536_v56, %v4605_v27  ;;  %v1568_v3 = vmul.f32 %v1536_v56, %v4609_v30  ;;  %v1565_v57 = vmul.f32 %v1532_v8, %v4603_v26  ;;  %v1567_v23 = vmul.f32 %v1532_v8, %v4607_v28  ;;  %v3863_v30 = vld [vmem:[#allocation8 + $0x28] sm:$0xff]  }
 0x3e1   : > { %v1611_v24 = vrot.slane %v1594_v59, %v4714_v62  ;;  %v1607_v60 = vrot.slane %v1594_v59, %v4704_v45  ;;  %v1601_v4 = vrot.slane %v1587_v17, %v4723_v7  ;;  %v1570_v34 = vmul.f32 %v1544_v10, %v4627_v12  ;;  %3286 = vmatpush3.bf16.msra.mxu1 %v3863_v30  ;;  %v3850_v30 = vld [vmem:[#allocation8 + $0xf8] sm:$0xff]  }
 0x3e2   : > { %v1572_v11 = vmul.f32 %v1544_v10, %v4632_v58  ;;  %v1602_v13 = vcombine.high %v1594_v59, %v1594_v59  ;;  %v1569_v61 = vmul.f32 %v1540_v20, %v4625_v50  ;;  %v1571_v27 = vmul.f32 %v1540_v20, %v4629_v54  ;;  %3287 = vmatprep.subr.bf16.mxu1 %v3864_v15  ;;  %v3836_v20 = vld [vmem:[#allocation8 + $0xc0] sm:$0xff]  }
 0x3e3   : > { %v1645_v26 = vadd.f32 %v1611_v24, %v1562_v47  ;;  %v1647_v18 = vadd.f32 %v1611_v24, %v1564_v49  ;;  %v1644_v28 = vadd.f32 %v1607_v60, %v1561_v51  ;;  %v1646_v42 = vadd.f32 %v1607_v60, %v1563_v52  ;;  %v3843_v24 = vld [vmem:[#allocation8 + $0x98] sm:$0xff]   ;;  %v3844_v60 = vld [vmem:[#allocation8 + $0xe0] sm:$0xff]  }
 0x3e4   : > { %v1619_v55 = vrot.slane %v1601_v4, %v4714_v62  ;;  %v1615_v19 = vrot.slane %v1601_v4, %v4704_v45  ;;  %v1627_v12 = vrot.slane %v1602_v13, %v4714_v62  ;;  %v1623_v58 = vrot.slane %v1602_v13, %v4704_v45  ;;  %v3847_v13 = vld [vmem:[#allocation8 + $0xa8] sm:$0xff]  }
 0x3e5   : > { %v4757_v0 = vpack.c.bf16 %v1647_v18, %v1645_v26  ;;  %v4759_v50 = vpack.c.bf16 %v1646_v42, %v1644_v28  ;;  %v1552_v54 = vrot.slane %v1520_v1, %v4714_v62  ;;  %v1603_v21 = vcombine.high %v1601_v4, %v1601_v4  ;;  %3288 = vmatpush3.bf16.msra.mxu1 %v3865_v37  ;;  %v3845_v4 = vld [vmem:[#allocation8 + $0xa0] sm:$0xff]   ;;  %v3895_v26 = vld [vmem:[%s5085_s2 + $0x18] sm:$0xff]   ;;  %v3897_v42 = vld [vmem:[%s5085_s2 + $0x28] sm:$0xff]  }
 0x3e6   : > { %v1649_v16 = vadd.f32 %v1619_v55, %v1566_v63  ;;  %v1651_v29 = vadd.f32 %v1619_v55, %v1568_v3  ;;  %v1648_v31 = vadd.f32 %v1615_v19, %v1565_v57  ;;  %v1650_v35 = vadd.f32 %v1615_v19, %v1567_v23  ;;  %v3840_v63 = vld [vmem:[#allocation8 + $0xd0] sm:$0xff]   ;;  %v3842_v57 = vld [vmem:[#allocation8 + $0xd8] sm:$0xff]   ;;  %v3893_v23 = vld [vmem:[%s5085_s2 + $0x8] sm:$0xff]  }
 0x3e7   : > { %1764 = vmatprep.subr.bf16.mxu0 %v4757_v0  ;;  %v1653_v38 = vadd.f32 %v1627_v12, %v1570_v34  ;;  %v1655_v39 = vadd.f32 %v1627_v12, %v1572_v11  ;;  %v1652_v22 = vadd.f32 %v1623_v58, %v1569_v61  ;;  %v1654_v41 = vadd.f32 %v1623_v58, %v1571_v27  ;;  %v3841_v3 = vld [vmem:[#allocation8 + $0x90] sm:$0xff]   ;;  %v3846_v34 = vld [vmem:[#allocation8 + $0xe8] sm:$0xff]   ;;  %v3851_v18 = vld [vmem:[#allocation8 + $0xb8] sm:$0xff]  }
 0x3e8   : > { %1765 = vmatpush1.bf16.msra.mxu0 %v4759_v50  ;;  %v4764_v44 = vpack.c.bf16 %v1651_v29, %v1649_v16  ;;  %v4766_v25 = vpack.c.bf16 %v1650_v35, %v1648_v31  ;;  %v1574_v33 = vmul.f32 %v1552_v54, %v4657_v5  ;;  %v1576_v9 = vmul.f32 %v1552_v54, %v4661_v40  ;;  %v3894_v11 = vld [vmem:[%s5085_s2 + $0x10] sm:$0xff]   ;;  %v3896_v28 = vld [vmem:[%s5085_s2 + $0x20] sm:$0xff]   ;;  %v3899_v19 = vld [vmem:[%s5085_s2 + $0x38] sm:$0xff]  }
 0x3e9   : > { %v4770_v46 = vpack.c.bf16 %v1655_v39, %v1653_v38  ;;  %v4772_v47 = vpack.c.bf16 %v1654_v41, %v1652_v22  ;;  %v1635_v49 = vrot.slane %v1603_v21, %v4714_v62  ;;  %v1548_v51 = vrot.slane %v1520_v1, %v4704_v45  ;;  %v3892_v1 = vld [vmem:[%s5085_s2] sm:$0xff]   ;;  %v3848_v61 = vld [vmem:[#allocation8 + $0xf0] sm:$0xff]   ;;  %v3867_v12 = vld [vmem:[#allocation8 + $0x38] sm:$0xff]  }
 0x3ea   : > { %1766 = vmatprep.subr.bf16.mxu0 %v4764_v44  ;;  %v1631_v52 = vrot.slane %v1603_v21, %v4704_v45  ;;  %v3849_v27 = vld [vmem:[#allocation8 + $0xb0] sm:$0xff]   ;;  %v3868_v58 = vld [vmem:[#allocation8 + $0x140] sm:$0xff]   ;;  %v3870_v31 = vld [vmem:[#allocation8 + $0x148] sm:$0xff]  }
 0x3eb   : > { %v1657_v56 = vadd.f32 %v1635_v49, %v1574_v33  ;;  %v1659_v8 = vadd.f32 %v1635_v49, %v1576_v9  ;;  %v1573_v5 = vmul.f32 %v1548_v51, %v4653_v32  ;;  %v1575_v40 = vmul.f32 %v1548_v51, %v4659_v36  ;;  %v3837_v32 = vld [vmem:[#allocation8 + $0x80] sm:$0xff]   ;;  %v3838_v36 = vld [vmem:[#allocation8 + $0xc8] sm:$0xff]   ;;  %v3898_v55 = vld [vmem:[%s5085_s2 + $0x30] sm:$0xff]  }
 0x3ec   : > { %1767 = vmatpush1.bf16.msra.mxu0 %v4766_v25  ;;  %v3869_v29 = vld [vmem:[#allocation8 + $0x100] sm:$0xff]   ;;  %v3871_v37 = vld [vmem:[#allocation8 + $0x108] sm:$0xff]   ;;  %v3872_v39 = vld [vmem:[#allocation8 + $0x150] sm:$0xff]  }
 0x3ed   : > { %1768 = vmatprep.subr.bf16.mxu0 %v4770_v46  ;;  %v4782_v10 = vpack.c.bf16 %v1659_v8, %v1657_v56  ;;  %v1656_v14 = vadd.f32 %v1631_v52, %v1573_v5  ;;  %v1658_v17 = vadd.f32 %v1631_v52, %v1575_v40  ;;  %v3873_v33 = vld [vmem:[#allocation8 + $0x110] sm:$0xff]   ;;  %v3874_v9 = vld [vmem:[#allocation8 + $0x158] sm:$0xff]   ;;  %v3876_v51 = vld [vmem:[#allocation8 + $0x160] sm:$0xff]  }
 0x3ee   : > { %v3877_v40 = vld [vmem:[#allocation8 + $0x120] sm:$0xff]  }
 0x3ef   : > { %v4784_v59 = vpack.c.bf16 %v1658_v17, %v1656_v14  ;;  %v3879_v17 = vld [vmem:[#allocation8 + $0x128] sm:$0xff]  }
 0x3f0   : > { %1769 = vmatpush1.bf16.msra.mxu0 %v4772_v47 }
 0x3f1   : > { %1770 = vmatprep.subr.bf16.mxu0 %v4782_v10 }
 0x3f4   : > { %1771 = vmatpush1.bf16.msra.mxu0 %v4784_v59 }
 0x3f5   : > { %3315 = vmatprep.subr.bf16.mxu0 %v3836_v20  ;;  %v3880_v20 = vld [vmem:[#allocation8 + $0x170] sm:$0xff]  }
 0x3f7   : > { %3199 = vmatmul.mubr.msk.bf16.vlgmr.msra.gmra.mrb[20].mxu0 %vm659_vm0, %v3892_v1 }
 0x3f8   : > { %1806 = vmatprep.mubr.bf16.mxu0 %v4176_v53  ;;  %3316 = vmatpush3.bf16.msra.mxu0 %v3837_v32 }
 0x3f9   : > { %3317 = vmatprep.subr.bf16.mxu0 %v3838_v36 }
 0x3fc   : > { %3318 = vmatpush3.bf16.msra.mxu0 %v3839_v6 }
 0x3fd   : > { %3319 = vmatprep.subr.bf16.mxu0 %v3840_v63  ;;  %v3881_v63 = vld [vmem:[#allocation8 + $0x130] sm:$0xff]  }
 0x3ff   : > { %3200 = vmatmul.mubr.msk.bf16.gmra.mrb[24].mxu0 %vm659_vm0, %v3893_v23  ;;  %v3883_v23 = vld [vmem:[#allocation8 + $0x138] sm:$0xff]  }
 0x400   : > { %1816 = vmatprep.mubr.bf16.mxu0 %v4176_v53  ;;  %3320 = vmatpush3.bf16.msra.mxu0 %v3841_v3  ;;  %v3882_v3 = vld [vmem:[#allocation8 + $0x178] sm:$0xff]  }
 0x401   : > { %3321 = vmatprep.subr.bf16.mxu0 %v3842_v57 }
 0x404   : > { %3322 = vmatpush3.bf16.msra.mxu0 %v3843_v24 }
 0x405   : > { %3323 = vmatprep.subr.bf16.mxu0 %v3844_v60 }
 0x407   : > { %3201 = vmatmul.mubr.msk.bf16.gmra.mrb[28].mxu0 %vm659_vm0, %v3894_v11 }
 0x408   : > { %1826 = vmatprep.mubr.bf16.mxu0 %v4176_v53  ;;  %3324 = vmatpush3.bf16.msra.mxu0 %v3845_v4 }
 0x409   : > { %3325 = vmatprep.subr.bf16.mxu0 %v3846_v34 }
 0x40c   : > { %3326 = vmatpush3.bf16.msra.mxu0 %v3847_v13 }
 0x40d   : > { %3327 = vmatprep.subr.bf16.mxu0 %v3848_v61 }
 0x40f   : > { %3202 = vmatmul.mubr.msk.bf16.gmra.mrb[32].mxu0 %vm659_vm0, %v3895_v26 }
 0x410   : > { %1836 = vmatprep.mubr.bf16.mxu0 %v4176_v53  ;;  %3328 = vmatpush3.bf16.msra.mxu0 %v3849_v27 }
 0x411   : > { %3329 = vmatprep.subr.bf16.mxu0 %v3850_v30 }
 0x414   : > { %3330 = vmatpush3.bf16.msra.mxu0 %v3851_v18 }
 0x417   : > { %3203 = vmatmul.mubr.msk.bf16.gmra.mrb[36].mxu0 %vm659_vm0, %v3896_v28 }
 0x418   : > { %1846 = vmatprep.mubr.bf16.mxu0 %v4176_v53 }
 0x41f   : > { %3204 = vmatmul.mubr.msk.bf16.gmra.mrb[40].mxu0 %vm659_vm0, %v3897_v42 }
 0x420   : > { %1856 = vmatprep.mubr.bf16.mxu0 %v4176_v53 }
 0x427   : > { %3205 = vmatmul.mubr.msk.bf16.gmra.mrb[44].mxu0 %vm659_vm0, %v3898_v55 }
 0x428   : > { %1866 = vmatprep.mubr.bf16.mxu0 %v4176_v53  ;;  %v3866_v53 = vld [vmem:[#allocation8 + $0x78] sm:$0xff]  }
 0x429   : > { %3289 = vmatprep.subr.bf16.mxu1 %v3866_v53 }
 0x42a   : > { %3290 = vmatpush3.bf16.msra.mxu1 %v3867_v12 }
 0x42b   : > { %3355 = vmatprep.subr.bf16.mxu1 %v3868_v58 }
 0x42f   : > { %3206 = vmatmul.mubr.msk.bf16.gmra.mrb[48].mxu0 %vm659_vm0, %v3899_v19 }
 0x430   : > { %2278 = vmatprep.mubr.bf16.mxu0 %v4757_v0 }
 0x437   : > { %2279 = vmatmul.mubr.bf16.vlgmr.msra.gmra.mrb[52].mxu0 %v4759_v50 }
 0x438   : > { %2286 = vmatprep.mubr.bf16.mxu0 %v4764_v44 }
 0x43f   : > { %2287 = vmatmul.mubr.bf16.gmra.mrb[56].mxu0 %v4766_v25 }
 0x440   : > { %2294 = vmatprep.mubr.bf16.mxu0 %v4770_v46 }
 0x447   : > { %2295 = vmatmul.mubr.bf16.gmra.mrb[60].mxu0 %v4772_v47  ;;  %v3875_v47 = vld [vmem:[#allocation8 + $0x118] sm:$0xff]  }
 0x448   : > { %2302 = vmatprep.mubr.bf16.mxu0 %v4782_v10  ;;  %v3878_v10 = vld [vmem:[#allocation8 + $0x168] sm:$0xff]  }
 0x44f   : > { %2303 = vmatmul.mubr.bf16.gmra.mrb[64].mxu0 %v4784_v59 }
 0x4ca   : > { %v1798_v0 = vpop.f32.mrb[20].mxu0 }
 0x4cb   : > { %v1800_v50 = vpop.f32.mrb[21].mxu0 }
 0x4cc   : > { %v1802_v54 = vpop.f32.mrb[22].mxu0 }
 0x4cd   : > { %v1877_v21 = vpack.c.bf16 %v1802_v54, %v1798_v0  ;;  %v1804_v15 = vpop.f32.mrb[23].mxu0 }
 0x4ce   : > { %v1878_v16 = vpack.c.bf16 %v1804_v15, %v1800_v50 }
 0x4d0   : > { %2213 = vmatprep.mubr.bf16.mxu1 %v1878_v16 }
 0x4d1   : > { %2214 = vmatmul.mubr.bf16.vlgmr.msra.gmra.mrb[16].mxu1 %v1877_v21 }
 0x4d2   : > { %3356 = vmatpush3.bf16.msra.mxu1 %v3869_v29  ;;  %v1808_v35 = vpop.f32.mrb[24].mxu0 }
 0x4d3   : > { %v1810_v38 = vpop.f32.mrb[25].mxu0  ;;  %3357 = vmatprep.subr.bf16.mxu1 %v3870_v31 }
 0x4d4   : > { %v1812_v22 = vpop.f32.mrb[26].mxu0 }
 0x4d5   : > { %v1879_v41 = vpack.c.bf16 %v1812_v22, %v1808_v35  ;;  %v1814_v44 = vpop.f32.mrb[27].mxu0 }
 0x4d6   : > { %v1880_v25 = vpack.c.bf16 %v1814_v44, %v1810_v38  ;;  %3358 = vmatpush3.bf16.msra.mxu1 %v3871_v37 }
 0x4d7   : > { %3359 = vmatprep.subr.bf16.mxu1 %v3872_v39 }
 0x4d8   : > { %2221 = vmatprep.mubr.bf16.mxu1 %v1880_v25 }
 0x4d9   : > { %2222 = vmatmul.mubr.bf16.gmra.mrb[20].mxu1 %v1879_v41 }
 0x4da   : > { %3360 = vmatpush3.bf16.msra.mxu1 %v3873_v33  ;;  %v1818_v46 = vpop.f32.mrb[28].mxu0 }
 0x4db   : > { %v1820_v49 = vpop.f32.mrb[29].mxu0  ;;  %3361 = vmatprep.subr.bf16.mxu1 %v3874_v9 }
 0x4dc   : > { %v1822_v52 = vpop.f32.mrb[30].mxu0 }
 0x4dd   : > { %v1881_v56 = vpack.c.bf16 %v1822_v52, %v1818_v46  ;;  %v1824_v8 = vpop.f32.mrb[31].mxu0 }
 0x4de   : > { %v1882_v5 = vpack.c.bf16 %v1824_v8, %v1820_v49  ;;  %3362 = vmatpush3.bf16.msra.mxu1 %v3875_v47 }
 0x4df   : > { %3363 = vmatprep.subr.bf16.mxu1 %v3876_v51 }
 0x4e0   : > { %2229 = vmatprep.mubr.bf16.mxu1 %v1882_v5 }
 0x4e1   : > { %2230 = vmatmul.mubr.bf16.gmra.mrb[24].mxu1 %v1881_v56 }
 0x4e2   : > { %3364 = vmatpush3.bf16.msra.mxu1 %v3877_v40  ;;  %v1828_v14 = vpop.f32.mrb[32].mxu0 }
 0x4e3   : > { %v1830_v59 = vpop.f32.mrb[33].mxu0  ;;  %3365 = vmatprep.subr.bf16.mxu1 %v3878_v10 }
 0x4e4   : > { %v1832_v32 = vpop.f32.mrb[34].mxu0 }
 0x4e5   : > { %v1883_v36 = vpack.c.bf16 %v1832_v32, %v1828_v14  ;;  %v1834_v1 = vpop.f32.mrb[35].mxu0  ;;  %v4178_v32 = vmov 0.0|0.0  }
 0x4e6   : > { %v1884_v6 = vpack.c.bf16 %v1834_v1, %v1830_v59  ;;  %3366 = vmatpush3.bf16.msra.mxu1 %v3879_v17  ;;  %v549_v17 = vld [vmem:[#allocation11] sm:$0xff]  ;;  %v550_v59 = vld [vmem:[#allocation11 + $0x8] sm:$0xff]  ;;  %3587 = vmatprep.subr.bf16.mxu0 %v4178_v32  ;;  %v552_v1 = vld [vmem:[#allocation11 + $0x18] sm:$0xff] }
 0x4e7   : > { %3367 = vmatprep.subr.bf16.mxu1 %v3880_v20  ;;  %v3588_v20 = vpack.c.bf16 %v550_v59, %v549_v17 }
 0x4e8   : > { %2237 = vmatprep.mubr.bf16.mxu1 %v1884_v6 }
 0x4e9   : > { %2238 = vmatmul.mubr.bf16.gmra.mrb[28].mxu1 %v1883_v36  ;;  %3589 = vmatpush3.bf16.msra.mxu0 %v3588_v20  ;;  %v551_v36 = vld [vmem:[#allocation11 + $0x10] sm:$0xff] }
 0x4ea   : > { %3368 = vmatpush3.bf16.msra.mxu1 %v3881_v63  ;;  %v1838_v57 = vpop.f32.mrb[36].mxu0  ;;  %3590 = vmatprep.subr.bf16.mxu0 %v4178_v32  ;;  %v3591_v6 = vpack.c.bf16 %v552_v1, %v551_v36  ;;  %v553_v63 = vld [vmem:[#allocation11 + $0x20] sm:$0xff] }
 0x4eb   : > { %v1840_v24 = vpop.f32.mrb[37].mxu0  ;;  %3369 = vmatprep.subr.bf16.mxu1 %v3882_v3  ;;  %v554_v3 = vld [vmem:[#allocation11 + $0x28] sm:$0xff] }
 0x4ec   : > { %v1842_v60 = vpop.f32.mrb[38].mxu0 }
 0x4ed   : > { %v1885_v4 = vpack.c.bf16 %v1842_v60, %v1838_v57  ;;  %v1844_v34 = vpop.f32.mrb[39].mxu0  ;;  %3592 = vmatpush3.bf16.msra.mxu0 %v3591_v6  ;;  %v3594_v57 = vpack.c.bf16 %v554_v3, %v553_v63 }
 0x4ee   : > { %v1886_v11 = vpack.c.bf16 %v1844_v34, %v1840_v24  ;;  %3370 = vmatpush3.bf16.msra.mxu1 %v3883_v23  ;;  %3593 = vmatprep.subr.bf16.mxu0 %v4178_v32  ;;  %v555_v23 = vld [vmem:[#allocation11 + $0x30] sm:$0xff]  ;;  %v556_v24 = vld [vmem:[#allocation11 + $0x38] sm:$0xff]  ;;  %v557_v34 = vld [vmem:[#allocation11 + $0x40] sm:$0xff] }
 0x4ef   : > { %3611 = vmatprep.subr.bf16.mxu1 %v4178_v32  ;;  %v3597_v60 = vpack.c.bf16 %v556_v24, %v555_v23 }
 0x4f0   : > { %2343 = vmatprep.mubr.bf16.mxu1 %v1886_v11  ;;  %v558_v11 = vld [vmem:[#allocation11 + $0x48] sm:$0xff] }
 0x4f1   : > { %2344 = vmatmul.mubr.bf16.vlgmr.msra.gmra.mrb[32].mxu1 %v1885_v4  ;;  %3595 = vmatpush3.bf16.msra.mxu0 %v3594_v57  ;;  %v4180_v4 = vmov 0.0  }
 0x4f2   : > { %v1848_v13 = vpop.f32.mrb[40].mxu0  ;;  %3613 = vmatpush3.bf16.msra.mxu1 %v3588_v20  ;;  %3485 = vmatprep.mubr.msk.f32.mxu0 %vm4179_vm8, %v4180_v4 }
 0x4f3   : > { %v1850_v61 = vpop.f32.mrb[41].mxu0  ;;  %3614 = vmatprep.subr.bf16.mxu1 %v4178_v32  ;;  %3596 = vmatprep.subr.bf16.mxu0 %v4178_v32 }
 0x4f4   : > { %v1852_v27 = vpop.f32.mrb[42].mxu0 }
 0x4f5   : > { %v1887_v30 = vpack.c.bf16 %v1852_v27, %v1848_v13  ;;  %v1854_v26 = vpop.f32.mrb[43].mxu0  ;;  %3598 = vmatpush3.bf16.msra.mxu0 %v3597_v60  ;;  %v3600_v13 = vpack.c.bf16 %v558_v11, %v557_v34  ;;  %v560_v27 = vld [vmem:[#allocation11 + $0x58] sm:$0xff]  ;;  %v463_v34 = vld [vmem:[%s4506_s21 + $0x10] sm:$0xff] }
 0x4f6   : > { %v1888_v18 = vpack.c.bf16 %v1854_v26, %v1850_v61  ;;  %3616 = vmatpush3.bf16.msra.mxu1 %v3591_v6  ;;  %3599 = vmatprep.subr.bf16.mxu0 %v4178_v32  ;;  %v559_v61 = vld [vmem:[#allocation11 + $0x50] sm:$0xff]  ;;  %v561_v26 = vld [vmem:[#allocation11 + $0x60] sm:$0xff] }
 0x4f7   : > { %3617 = vmatprep.subr.bf16.mxu1 %v4178_v32 }
 0x4f8   : > { %2351 = vmatprep.mubr.bf16.mxu1 %v1888_v18  ;;  %v562_v18 = vld [vmem:[#allocation11 + $0x68] sm:$0xff] }
 0x4f9   : > { %2352 = vmatmul.mubr.bf16.gmra.mrb[36].mxu1 %v1887_v30  ;;  %3601 = vmatpush3.bf16.msra.mxu0 %v3600_v13  ;;  %v3603_v30 = vpack.c.bf16 %v560_v27, %v559_v61  ;;  %v461_v61 = vld [vmem:[%s4506_s21] sm:$0xff]  ;;  %v464_v27 = vld [vmem:[%s4506_s21 + $0x18] sm:$0xff] }
 0x4fa   : > { %v1858_v28 = vpop.f32.mrb[44].mxu0  ;;  %3619 = vmatpush3.bf16.msra.mxu1 %v3594_v57  ;;  %3602 = vmatprep.subr.bf16.mxu0 %v4178_v32 }
 0x4fb   : > { %v1860_v42 = vpop.f32.mrb[45].mxu0  ;;  %3620 = vmatprep.subr.bf16.mxu1 %v4178_v32 }
 0x4fc   : > { %v1862_v55 = vpop.f32.mrb[46].mxu0 }
 0x4fd   : > { %v1889_v19 = vpack.c.bf16 %v1862_v55, %v1858_v28  ;;  %v1864_v53 = vpop.f32.mrb[47].mxu0  ;;  %3604 = vmatpush3.bf16.msra.mxu0 %v3603_v30  ;;  %v3606_v28 = vpack.c.bf16 %v562_v18, %v561_v26  ;;  %v564_v55 = vld [vmem:[#allocation11 + $0x78] sm:$0xff] }
 0x4fe   : > { %v1890_v12 = vpack.c.bf16 %v1864_v53, %v1860_v42  ;;  %3622 = vmatpush3.bf16.msra.mxu1 %v3597_v60  ;;  %3605 = vmatprep.subr.bf16.mxu0 %v4178_v32  ;;  %v563_v42 = vld [vmem:[#allocation11 + $0x70] sm:$0xff] }
 0x4ff   : > { %3623 = vmatprep.subr.bf16.mxu1 %v4178_v32 }
 0x500   : > { %2359 = vmatprep.mubr.bf16.mxu1 %v1890_v12 }
 0x501   : > { %2360 = vmatmul.mubr.bf16.gmra.mrb[40].mxu1 %v1889_v19  ;;  %3607 = vmatpush3.bf16.msra.mxu0 %v3606_v28  ;;  %v3609_v19 = vpack.c.bf16 %v564_v55, %v563_v42 }
 0x502   : > { %v1868_v58 = vpop.f32.mrb[48].mxu0  ;;  %3625 = vmatpush3.bf16.msra.mxu1 %v3600_v13  ;;  %3608 = vmatprep.subr.bf16.mxu0 %v4178_v32 }
 0x503   : > { %v1870_v0 = vpop.f32.mrb[49].mxu0  ;;  %3626 = vmatprep.subr.bf16.mxu1 %v4178_v32 }
 0x504   : > { %v1872_v50 = vpop.f32.mrb[50].mxu0 }
 0x505   : > { %v1891_v54 = vpack.c.bf16 %v1872_v50, %v1868_v58  ;;  %v1874_v21 = vpop.f32.mrb[51].mxu0  ;;  %3610 = vmatpush3.bf16.msra.mxu0 %v3609_v19 }
 0x506   : > { %v1892_v15 = vpack.c.bf16 %v1874_v21, %v1870_v0  ;;  %3628 = vmatpush3.bf16.msra.mxu1 %v3603_v30 }
 0x507   : > { %3629 = vmatprep.subr.bf16.mxu1 %v4178_v32 }
 0x508   : > { %2367 = vmatprep.mubr.bf16.mxu1 %v1892_v15 }
 0x509   : > { %2368 = vmatmul.mubr.bf16.gmra.mrb[44].mxu1 %v1891_v54 }
 0x50a   : > { %v3331_v16 = vpop.f32.mrb[52].mxu0  ;;  %3520 = vmatprep.mubr.msk.f32.mxu1 %vm4179_vm8, %v4180_v4  ;;  %3631 = vmatpush3.bf16.msra.mxu1 %v3606_v28 }
 0x50b   : > { %v3332_v29 = vpop.f32.mrb[53].mxu0  ;;  %3632 = vmatprep.subr.bf16.mxu1 %v4178_v32 }
 0x50c   : > { %v4836_v31 = vadd.f32 %v3332_v29, %v3331_v16  ;;  %v3334_v35 = vpop.f32.mrb[54].mxu0 }
 0x50d   : > { %v3335_v37 = vpop.f32.mrb[55].mxu0 }
 0x50e   : > { %v4838_v38 = vadd.f32 %v3335_v37, %v3334_v35  ;;  %3634 = vmatpush3.bf16.msra.mxu1 %v3609_v19 }
 0x512   : > { %v3337_v39 = vpop.f32.mrb[56].mxu0 }
 0x513   : > { %v3338_v22 = vpop.f32.mrb[57].mxu0 }
 0x514   : > { %v4840_v41 = vadd.f32 %v3338_v22, %v3337_v39  ;;  %v3340_v44 = vpop.f32.mrb[58].mxu0 }
 0x515   : > { %v3341_v25 = vpop.f32.mrb[59].mxu0 }
 0x516   : > { %v4842_v33 = vadd.f32 %v3341_v25, %v3340_v44 }
 0x51a   : > { %v3343_v9 = vpop.f32.mrb[60].mxu0 }
 0x51b   : > { %v3344_v46 = vpop.f32.mrb[61].mxu0 }
 0x51c   : > { %v4844_v47 = vadd.f32 %v3344_v46, %v3343_v9  ;;  %v3346_v49 = vpop.f32.mrb[62].mxu0 }
 0x51d   : > { %v3347_v51 = vpop.f32.mrb[63].mxu0 }
 0x51e   : > { %v4846_v52 = vadd.f32 %v3347_v51, %v3346_v49 }
 0x522   : > { %v3349_v56 = vpop.f32.mrb[64].mxu0 }
 0x523   : > { %v3350_v8 = vpop.f32.mrb[65].mxu0 }
 0x524   : > { %v4848_v5 = vadd.f32 %v3350_v8, %v3349_v56  ;;  %v3352_v40 = vpop.f32.mrb[66].mxu0 }
 0x525   : > { %v3353_v10 = vpop.f32.mrb[67].mxu0 }
 0x526   : > { %v4850_v14 = vadd.f32 %v3353_v10, %v3352_v40 }
 0x5a4   : > { %v3291_v53 = vpop.f32.mrb[16].mxu1 }
 0x5a5   : > { %v3292_v12 = vpop.f32.mrb[17].mxu1 }
 0x5a6   : > { %v3293_v58 = vadd.f32 %v3292_v12, %v3291_v53  ;;  %v3294_v0 = vpop.f32.mrb[18].mxu1 }
 0x5a7   : > { %v3295_v50 = vpop.f32.mrb[19].mxu1 }
 0x5a8   : > { %v2281_v54 = vadd.f32 %v4836_v31, %v3293_v58  ;;  %v3296_v21 = vadd.f32 %v3295_v50, %v3294_v0 }
 0x5aa   : > { %v2284_v15 = vadd.f32 %v4838_v38, %v3296_v21 }
 0x5ac   : > { %v3297_v16 = vpop.f32.mrb[20].mxu1 }
 0x5ad   : > { %v3298_v29 = vpop.f32.mrb[21].mxu1 }
 0x5ae   : > { %v3299_v35 = vadd.f32 %v3298_v29, %v3297_v16  ;;  %v3300_v37 = vpop.f32.mrb[22].mxu1  ;;  %v465_v29 = vld [vmem:[%s4506_s21 + $0x20] sm:$0xff] }
 0x5af   : > { %v3301_v39 = vpop.f32.mrb[23].mxu1 }
 0x5b0   : > { %v2289_v22 = vadd.f32 %v4840_v41, %v3299_v35  ;;  %v3302_v44 = vadd.f32 %v3301_v39, %v3300_v37 }
 0x5b2   : > { %v2292_v25 = vadd.f32 %v4842_v33, %v3302_v44  ;;  %v466_v44 = vld [vmem:[%s4506_s21 + $0x28] sm:$0xff] }
 0x5b4   : > { %v3303_v9 = vpop.f32.mrb[24].mxu1 }
 0x5b5   : > { %v3304_v46 = vpop.f32.mrb[25].mxu1 }
 0x5b6   : > { %v3305_v49 = vadd.f32 %v3304_v46, %v3303_v9  ;;  %v3306_v51 = vpop.f32.mrb[26].mxu1 }
 0x5b7   : > { %v3307_v56 = vpop.f32.mrb[27].mxu1 }
 0x5b8   : > { %v2297_v31 = vadd.f32 %v4844_v47, %v3305_v49  ;;  %v3308_v8 = vadd.f32 %v3307_v56, %v3306_v51 }
 0x5ba   : > { %v2300_v38 = vadd.f32 %v4846_v52, %v3308_v8 }
 0x5bc   : > { %v3309_v40 = vpop.f32.mrb[28].mxu1 }
 0x5bd   : > { %v3310_v10 = vpop.f32.mrb[29].mxu1 }
 0x5be   : > { %v3311_v17 = vadd.f32 %v3310_v10, %v3309_v40  ;;  %v3312_v59 = vpop.f32.mrb[30].mxu1 }
 0x5bf   : > { %v3313_v20 = vpop.f32.mrb[31].mxu1 }
 0x5c0   : > { %v2305_v41 = vadd.f32 %v4848_v5, %v3311_v17  ;;  %v3314_v33 = vadd.f32 %v3313_v20, %v3312_v59  ;;  %v462_v5 = vld [vmem:[%s4506_s21 + $0x8] sm:$0xff] }
 0x5c2   : > { %v4860_v32 = vadd.f32 %v4850_v14, %v3314_v33  ;;  %v467_v33 = vld [vmem:[%s4506_s21 + $0x30] sm:$0xff] }
 0x5c4   : > { %v3371_v36 = vpop.f32.mrb[32].mxu1 }
 0x5c5   : > { %v3372_v1 = vpop.f32.mrb[33].mxu1 }
 0x5c6   : > { %v3373_v47 = vadd.f32 %v3372_v1, %v3371_v36  ;;  %v3374_v6 = vpop.f32.mrb[34].mxu1 }
 0x5c7   : > { %v3375_v52 = vpop.f32.mrb[35].mxu1 }
 0x5c8   : > { %v2346_v63 = vadd.f32 %v3373_v47, %v2281_v54  ;;  %v3376_v3 = vadd.f32 %v3375_v52, %v3374_v6 }
 0x5ca   : > { %v2349_v57 = vadd.f32 %v3376_v3, %v2284_v15  ;;  %v4870_v28 = vadd.f32 %v2346_v63, %v461_v61 }
 0x5cc   : > { %v3377_v23 = vpop.f32.mrb[36].mxu1  ;;  %v4866_v30 = vadd.f32 %v2349_v57, %v462_v5  ;;  %v2412_v21 = vmul.f32 %v4870_v28, %v4870_v28 }
 0x5cd   : > { %v3378_v24 = vpop.f32.mrb[37].mxu1 }
 0x5ce   : > { %v3379_v60 = vadd.f32 %v3378_v24, %v3377_v23  ;;  %v3380_v4 = vpop.f32.mrb[38].mxu1  ;;  %v2413_v53 = vmul.f32 %v4866_v30, %v4866_v30  ;;  %v2384_v35 = vadd.f32 %v4866_v30, %v4870_v28  ;;  %v468_v23 = vld [vmem:[%s4506_s21 + $0x38] sm:$0xff] }
 0x5cf   : > { %v3381_v11 = vpop.f32.mrb[39].mxu1 }
 0x5d0   : > { %v2354_v13 = vadd.f32 %v3379_v60, %v2289_v22  ;;  %v3382_v14 = vadd.f32 %v3381_v11, %v3380_v4  ;;  %v2420_v22 = vadd.f32 %v2413_v53, %v2412_v21  ;;  %v2385_v56 = vrot.slane %v2384_v35, 4 }
 0x5d2   : > { %v4868_v26 = vadd.f32 %v2354_v13, %v463_v34  ;;  %v2357_v18 = vadd.f32 %v3382_v14, %v2292_v25  ;;  %v2421_v10 = vrot.slane %v2420_v22, 4  ;;  %v2386_v63 = vadd.f32 %v2385_v56, %v2384_v35 }
 0x5d4   : > { %v4872_v42 = vadd.f32 %v2357_v18, %v464_v27  ;;  %v3383_v55 = vpop.f32.mrb[40].mxu1  ;;  %v2414_v12 = vmul.f32 %v4868_v26, %v4868_v26  ;;  %v2422_v24 = vadd.f32 %v2421_v10, %v2420_v22  ;;  %v2387_v61 = vrot.slane %v2386_v63, 2 }
 0x5d5   : > { %v3384_v19 = vpop.f32.mrb[41].mxu1 }
 0x5d6   : > { %v2415_v58 = vmul.f32 %v4872_v42, %v4872_v42  ;;  %v3386_v0 = vpop.f32.mrb[42].mxu1  ;;  %v3385_v50 = vadd.f32 %v3384_v19, %v3383_v55  ;;  %v2391_v15 = vadd.f32 %v4872_v42, %v4868_v26 }
 0x5d7   : > { %v3387_v54 = vpop.f32.mrb[43].mxu1 }
 0x5d8   : > { %v2427_v16 = vadd.f32 %v2415_v58, %v2414_v12  ;;  %v2362_v37 = vadd.f32 %v3385_v50, %v2297_v31  ;;  %v3388_v39 = vadd.f32 %v3387_v54, %v3386_v0  ;;  %v2392_v46 = vrot.slane %v2391_v15, 4 }
 0x5da   : > { %v4888_v25 = vadd.f32 %v2362_v37, %v465_v29  ;;  %v2365_v9 = vadd.f32 %v3388_v39, %v2300_v38  ;;  %v2428_v49 = vrot.slane %v2427_v16, 4  ;;  %v2393_v1 = vadd.f32 %v2392_v46, %v2391_v15 }
 0x5db   : > { %v2388_v15 = vadd.f32 %v2387_v61, %v2386_v63 }
 0x5dc   : > { %v3389_v51 = vpop.f32.mrb[44].mxu1  ;;  %v4890_v8 = vadd.f32 %v2365_v9, %v466_v44  ;;  %v2416_v31 = vmul.f32 %v4888_v25, %v4888_v25  ;;  %v2429_v47 = vadd.f32 %v2428_v49, %v2427_v16  ;;  %v2394_v11 = vrot.slane %v2393_v1, 2 }
 0x5dd   : > { %v3390_v40 = vpop.f32.mrb[45].mxu1  ;;  %v2389_v49 = vrot.slane %v2388_v15, 1 }
 0x5de   : > { %v3391_v17 = vadd.f32 %v3390_v40, %v3389_v51  ;;  %v3392_v59 = vpop.f32.mrb[46].mxu1  ;;  %v2398_v20 = vadd.f32 %v4890_v8, %v4888_v25  ;;  %v2417_v38 = vmul.f32 %v4890_v8, %v4890_v8  ;;  %v2430_v13 = vrot.slane %v2429_v47, 2 }
 0x5df   : > { %v3393_v36 = vpop.f32.mrb[47].mxu1  ;;  %v2395_v12 = vadd.f32 %v2394_v11, %v2393_v1 }
 0x5e0   : > { %v2370_v6 = vadd.f32 %v3391_v17, %v2305_v41  ;;  %v3394_v52 = vadd.f32 %v3393_v36, %v3392_v59  ;;  %v2399_v3 = vrot.slane %v2398_v20, 4  ;;  %v2434_v57 = vadd.f32 %v2417_v38, %v2416_v31 }
 0x5e1   : > { %v2423_v41 = vrot.slane %v2422_v24, 2  ;;  %v2431_v58 = vadd.f32 %v2430_v13, %v2429_v47  ;;  %v2396_v37 = vrot.slane %v2395_v12, 1 }
 0x5e2   : > { %v4900_v60 = vadd.f32 %v2370_v6, %v467_v33  ;;  %v2373_v4 = vadd.f32 %v3394_v52, %v4860_v32  ;;  %v2400_v5 = vadd.f32 %v2399_v3, %v2398_v20  ;;  %v2435_v34 = vrot.slane %v2434_v57, 4 }
 0x5e3   : > { %v2424_v16 = vadd.f32 %v2423_v41, %v2422_v24  ;;  %v2432_v39 = vrot.slane %v2431_v58, 1  ;;  %v2397_v10 = vadd.f32 %v2396_v37, %v2395_v12  ;;  %v2390_v33 = vadd.f32 %v2389_v49, %v2388_v15  ;;  %v4921_v41 = vld [vmem:[%s5089_s6] sm:$0xf] }
 0x5e4   : > { %v4903_v14 = vadd.f32 %v2373_v4, %v468_v23  ;;  %v2401_v27 = vrot.slane %v2400_v5, 2  ;;  %v2436_v18 = vadd.f32 %v2435_v34, %v2434_v57  ;;  %v2418_v55 = vmul.f32 %v4900_v60, %v4900_v60 }
 0x5e5   : > { %v2425_v51 = vrot.slane %v2424_v16, 1  ;;  %v2433_v59 = vadd.f32 %v2432_v39, %v2431_v58  ;;  %v2452_v52 = vsel %vm1327_vm2, %v2397_v10, %v2390_v33  ;;  %v2555_v12 = vrot.slane %v4921_v41, %v4714_v62 }
 0x5e6   : > { %v2405_v19 = vadd.f32 %v4903_v14, %v4900_v60  ;;  %v2419_v53 = vmul.f32 %v4903_v14, %v4903_v14  ;;  %v2437_v32 = vrot.slane %v2436_v18, 2  ;;  %v2402_v54 = vadd.f32 %v2401_v27, %v2400_v5 }
 0x5e7   : > { %v2426_v1 = vadd.f32 %v2425_v51, %v2424_v16 }
 0x5e8   : > { %v2406_v0 = vrot.slane %v2405_v19, 4  ;;  %v2441_v50 = vadd.f32 %v2419_v53, %v2418_v55  ;;  %v2438_v21 = vadd.f32 %v2437_v32, %v2436_v18  ;;  %v2403_v9 = vrot.slane %v2402_v54, 1 }
 0x5e9   : > { %v2460_v63 = vsel %vm1346_vm1, %v2433_v59, %v2426_v1  ;;  %v2546_v55 = vrot.slane %v4921_v41, %v4704_v45 }
 0x5ea   : > { %v2407_v29 = vadd.f32 %v2406_v0, %v2405_v19  ;;  %v2442_v35 = vrot.slane %v2441_v50, 4  ;;  %v2439_v46 = vrot.slane %v2438_v21, 1  ;;  %v2404_v20 = vadd.f32 %v2403_v9, %v2402_v54 }
 0x5ec   : > { %v2408_v22 = vrot.slane %v2407_v29, 2  ;;  %v2443_v44 = vadd.f32 %v2442_v35, %v2441_v50  ;;  %v2440_v38 = vadd.f32 %v2439_v46, %v2438_v21  ;;  %v2453_v3 = vsel %vm1329_vm4, %v2404_v20, %v2452_v52 }
 0x5ee   : > { %v2409_v56 = vadd.f32 %v2408_v22, %v2407_v29  ;;  %v2444_v40 = vrot.slane %v2443_v44, 2  ;;  %v2461_v57 = vsel %vm1348_vm3, %v2440_v38, %v2460_v63  ;;  %v3900_v63 = vld [vmem:[%s4498_s30] sm:$0xff] }
 0x5f0   : > { %v2410_v17 = vrot.slane %v2409_v56, 1  ;;  %v2445_v31 = vadd.f32 %v2444_v40, %v2443_v44 }
 0x5f2   : > { %v2411_v36 = vadd.f32 %v2410_v17, %v2409_v56  ;;  %v2446_v47 = vrot.slane %v2445_v31, 1 }
 0x5f4   : > { %v2447_v6 = vadd.f32 %v2446_v47, %v2445_v31  ;;  %v2454_v23 = vsel %vm1331_vm6, %v2411_v36, %v2453_v3 }
 0x5f6   : > { %v2462_v24 = vsel %vm1350_vm5, %v2447_v6, %v2461_v57  ;;  %v3901_v57 = vld [vmem:[%s4498_s30 + $0x8] sm:$0xff] }
 0x5f7   : > { %v2464_v4 = vsel %vm1357_vm7, %v2454_v23, %v2462_v24  ;;  %v3902_v24 = vld [vmem:[%s4498_s30 + $0x10] sm:$0xff] }
 0x5f8   : > { %3486 = vmatmul.mubr.f32.vlgmr.msra.gmra.mrb[18].mxu0 %v2464_v4 }
 0x6cb   : > { %v2531_v5 = vpop.f32.mrb[18].mxu0 }
 0x6cc   : > { %v2535_v34 = vmul.f32 %v2531_v5, %v2531_v5  ;;  %v3487_v11 = vpop.f32.mrb[19].mxu0 }
 0x6ce   : > { %v2537_v13 = vrot.slane %v2535_v34, 4  ;;  %v3904_v34 = vld [vmem:[%s4498_s30 + $0x20] sm:$0xff] }
 0x6d0   : > { %v2539_v61 = vsub.f32 %v2531_v5, %v2537_v13  ;;  %v3905_v13 = vld [vmem:[%s4498_s30 + $0x28] sm:$0xff] }
 0x6d2   : > { %v2540_v27 = vmax.f32 %v2539_v61, 0.0 }
 0x6d4   : > { %v2541_v18 = vadd.f32 1e-05, %v2540_v27 }
 0x6d6   : > { %3888 = vrsqrt.f32 %v2541_v18 }
 0x6e0   : > { %v3889_v19 = vpop.eup %3888 }
 0x6e1   : > { %v2547_v53 = vmul.f32 %v3889_v19, %v2546_v55  ;;  %v3906_v55 = vld [vmem:[%s4498_s30 + $0x30] sm:$0xff] }
 0x6e3   : > { %v2549_v32 = vrot.slane %v2547_v53, 4  ;;  %v2557_v58 = vcombine.high %v2547_v53, %v2547_v53  ;;  %v3907_v53 = vld [vmem:[%s4498_s30 + $0x38] sm:$0xff] }
 0x6e5   : > { %v2551_v0 = vmul.f32 %v2549_v32, %v2531_v5  ;;  %v2564_v50 = vrot.slane %v2557_v58, %v4723_v7 }
 0x6e7   : > { %v2556_v54 = vsub.f32 %v2555_v12, %v2551_v0  ;;  %v2565_v21 = vcombine.high %v2564_v50, %v2564_v50  ;;  %v2572_v15 = vrot.slane %v2564_v50, %v4723_v7 }
 0x6e9   : > { %v2579_v16 = vrot.slane %v2565_v21, %v4723_v7  ;;  %v2580_v29 = vcombine.high %v2572_v15, %v2572_v15  ;;  %v2617_v35 = vrot.slane %v2556_v54, %v4723_v7  ;;  %v2585_v37 = vrot.slane %v2572_v15, %v4704_v45 }
 0x6eb   : > { %v2581_v39 = vcombine.high %v2579_v16, %v2579_v16  ;;  %v2589_v22 = vrot.slane %v2579_v16, %v4704_v45  ;;  %v2593_v62 = vrot.slane %v2580_v29, %v4704_v45  ;;  %v2618_v44 = vcombine.high %v2617_v35, %v2617_v35 }
 0x6ec   : > { %v2625_v9 = vrot.slane %v2617_v35, %v4723_v7  ;;  %v2602_v49 = vmul.f32 %v2585_v37, %v4870_v28  ;;  %v2603_v10 = vmul.f32 %v2585_v37, %v4866_v30 }
 0x6ed   : > { %v2597_v46 = vrot.slane %v2581_v39, %v4704_v45  ;;  %v2632_v51 = vrot.slane %v2618_v44, %v4723_v7  ;;  %v2604_v17 = vmul.f32 %v2589_v22, %v4868_v26  ;;  %v2605_v59 = vmul.f32 %v2589_v22, %v4872_v42 }
 0x6ee   : > { %v2633_v56 = vcombine.high %v2625_v9, %v2625_v9  ;;  %v2638_v40 = vrot.slane %v2625_v9, %v4704_v45  ;;  %v2606_v31 = vmul.f32 %v2593_v62, %v4888_v25  ;;  %v2607_v36 = vmul.f32 %v2593_v62, %v4890_v8 }
 0x6ef   : > { %v2634_v20 = vcombine.high %v2632_v51, %v2632_v51  ;;  %v2642_v38 = vrot.slane %v2632_v51, %v4704_v45  ;;  %v2608_v1 = vmul.f32 %v2597_v46, %v4900_v60  ;;  %v2609_v30 = vmul.f32 %v2597_v46, %v4903_v14  ;;  %v3903_v14 = vld [vmem:[%s4498_s30 + $0x18] sm:$0xff]  ;;  %s3262_s30 = sshll.u32 %s4255_s13, 10 }
 0x6f0   : > { %v2646_v28 = vrot.slane %v2633_v56, %v4704_v45  ;;  %v2655_v33 = vadd.f32 %v2638_v40, %v2602_v49  ;;  %v2656_v26 = vadd.f32 %v2638_v40, %v2603_v10  ;;  %s5037_s26 = scalar_lea.hbm %s5092_s9, %s3262_s30 }
 0x6f1   : > { %v2650_v42 = vrot.slane %v2634_v20, %v4704_v45  ;;  %v2657_v25 = vadd.f32 %v2642_v38, %v2604_v17  ;;  %v2658_v47 = vadd.f32 %v2642_v38, %v2605_v59 }
 0x6f2   : > { %v2659_v6 = vadd.f32 %v2646_v28, %v2606_v31  ;;  %v2660_v52 = vadd.f32 %v2646_v28, %v2607_v36  ;;  %v2663_v3 = vadd.f32 %v3900_v63, %v2655_v33  ;;  %v2664_v8 = vadd.f32 %v3901_v57, %v2656_v26 }
 0x6f3   : > { %v2661_v23 = vadd.f32 %v2650_v42, %v2608_v1  ;;  %v2662_v60 = vadd.f32 %v2650_v42, %v2609_v30  ;;  %v2665_v4 = vadd.f32 %v3902_v24, %v2657_v25  ;;  %v2666_v5 = vadd.f32 %v3903_v14, %v2658_v47 }
 0x6f4   : > { %v2667_v11 = vadd.f32 %v3904_v34, %v2659_v6  ;;  %v2668_v61 = vadd.f32 %v3905_v13, %v2660_v52  ;;  %v4955_v27 = vmax.f32 %v2663_v3, 0.0  ;;  %v4957_v18 = vmax.f32 %v2664_v8, 0.0 }
 0x6f5   : > { %v2669_v19 = vadd.f32 %v3906_v55, %v2661_v23  ;;  %v2670_v32 = vadd.f32 %v3907_v53, %v2662_v60  ;;  %v4961_v12 = vmax.f32 %v2665_v4, 0.0  ;;  %v4963_v58 = vmax.f32 %v2666_v5, 0.0 }
 0x6f6   : > { %v4965_v0 = vmax.f32 %v2667_v11, 0.0  ;;  %v4967_v50 = vmax.f32 %v2668_v61, 0.0  ;;  %v2679_v54 = vadd.f32 %v4957_v18, %v4955_v27  ;;  %v2707_v21 = vmul.f32 %v4955_v27, %v4955_v27 }
 0x6f7   : > { %v4973_v15 = vmax.f32 %v2669_v19, 0.0  ;;  %v4975_v16 = vmax.f32 %v2670_v32, 0.0  ;;  %v2686_v29 = vadd.f32 %v4963_v58, %v4961_v12  ;;  %v2708_v35 = vmul.f32 %v4957_v18, %v4957_v18 }
 0x6f8   : > { %v2680_v37 = vrot.slane %v2679_v54, 4  ;;  %v2709_v39 = vmul.f32 %v4961_v12, %v4961_v12  ;;  %v2710_v22 = vmul.f32 %v4963_v58, %v4963_v58  ;;  %v2711_v62 = vmul.f32 %v4965_v0, %v4965_v0 }
 0x6f9   : > { %v2712_v44 = vmul.f32 %v4967_v50, %v4967_v50  ;;  %v2715_v9 = vadd.f32 %v2708_v35, %v2707_v21  ;;  %v2687_v46 = vrot.slane %v2686_v29, 4  ;;  %v2693_v49 = vadd.f32 %v4967_v50, %v4965_v0 }
 0x6fa   : > { %v2681_v51 = vadd.f32 %v2680_v37, %v2679_v54  ;;  %v2700_v56 = vadd.f32 %v4975_v16, %v4973_v15  ;;  %v2713_v40 = vmul.f32 %v4973_v15, %v4973_v15  ;;  %v2714_v10 = vmul.f32 %v4975_v16, %v4975_v16 }
 0x6fb   : > { %v2688_v17 = vadd.f32 %v2687_v46, %v2686_v29  ;;  %v2694_v59 = vrot.slane %v2693_v49, 4  ;;  %v2716_v31 = vrot.slane %v2715_v9, 4  ;;  %v2722_v20 = vadd.f32 %v2710_v22, %v2709_v39 }
 0x6fc   : > { %v2682_v38 = vrot.slane %v2681_v51, 2  ;;  %v2701_v28 = vrot.slane %v2700_v56, 4  ;;  %v2729_v33 = vadd.f32 %v2712_v44, %v2711_v62  ;;  %v2736_v36 = vadd.f32 %v2714_v10, %v2713_v40 }
 0x6fd   : > { %v2689_v1 = vrot.slane %v2688_v17, 2  ;;  %v2695_v30 = vadd.f32 %v2694_v59, %v2693_v49  ;;  %v2717_v26 = vadd.f32 %v2716_v31, %v2715_v9  ;;  %v2723_v42 = vrot.slane %v2722_v20, 4 }
 0x6fe   : > { %v2683_v25 = vadd.f32 %v2682_v38, %v2681_v51  ;;  %v2702_v47 = vadd.f32 %v2701_v28, %v2700_v56  ;;  %v2730_v6 = vrot.slane %v2729_v33, 4  ;;  %v2737_v52 = vrot.slane %v2736_v36, 4 }
 0x6ff   : > { %v2690_v63 = vadd.f32 %v2689_v1, %v2688_v17  ;;  %v2696_v3 = vrot.slane %v2695_v30, 2  ;;  %v2718_v57 = vrot.slane %v2717_v26, 2  ;;  %v2724_v8 = vadd.f32 %v2723_v42, %v2722_v20 }
 0x700   : > { %v2684_v23 = vrot.slane %v2683_v25, 1  ;;  %v2703_v60 = vrot.slane %v2702_v47, 2  ;;  %v2731_v24 = vadd.f32 %v2730_v6, %v2729_v33  ;;  %v2738_v4 = vadd.f32 %v2737_v52, %v2736_v36 }
 0x701   : > { %v2691_v14 = vrot.slane %v2690_v63, 1  ;;  %v2697_v5 = vadd.f32 %v2696_v3, %v2695_v30  ;;  %v2719_v34 = vadd.f32 %v2718_v57, %v2717_v26  ;;  %v2725_v11 = vrot.slane %v2724_v8, 2 }
 0x702   : > { %v2685_v13 = vadd.f32 %v2684_v23, %v2683_v25  ;;  %v2704_v61 = vadd.f32 %v2703_v60, %v2702_v47  ;;  %v2732_v55 = vrot.slane %v2731_v24, 2  ;;  %v2739_v19 = vrot.slane %v2738_v4, 2 }
 0x703   : > { %v2692_v53 = vadd.f32 %v2691_v14, %v2690_v63  ;;  %v2698_v32 = vrot.slane %v2697_v5, 1  ;;  %v2720_v54 = vrot.slane %v2719_v34, 1  ;;  %v2726_v21 = vadd.f32 %v2725_v11, %v2724_v8 }
 0x704   : > { %v2705_v29 = vrot.slane %v2704_v61, 1  ;;  %v2733_v35 = vadd.f32 %v2732_v55, %v2731_v24  ;;  %v2740_v37 = vadd.f32 %v2739_v19, %v2738_v4  ;;  %v2841_v25 = vrot.slane %v4921_v41, %v1454_v48 }
 0x705   : > { %v2699_v39 = vadd.f32 %v2698_v32, %v2697_v5  ;;  %v2727_v22 = vrot.slane %v2726_v21, 1  ;;  %v2747_v62 = vsel %vm1327_vm2, %v2692_v53, %v2685_v13  ;;  %v2721_v49 = vadd.f32 %v2720_v54, %v2719_v34 }
 0x706   : > { %v2734_v44 = vrot.slane %v2733_v35, 1  ;;  %v2741_v9 = vrot.slane %v2740_v37, 1  ;;  %v2706_v46 = vadd.f32 %v2705_v29, %v2704_v61  ;;  %v2850_v63 = vrot.slane %v4921_v41, %v1482_v2 }
 0x707   : > { %v2728_v51 = vadd.f32 %v2727_v22, %v2726_v21  ;;  %v2748_v10 = vsel %vm1329_vm4, %v2699_v39, %v2747_v62 }
 0x708   : > { %v2735_v56 = vadd.f32 %v2734_v44, %v2733_v35  ;;  %v2742_v40 = vadd.f32 %v2741_v9, %v2740_v37  ;;  %v2749_v31 = vsel %vm1331_vm6, %v2706_v46, %v2748_v10 }
 0x709   : > { %v2755_v17 = vsel %vm1346_vm1, %v2728_v51, %v2721_v49 }
 0x70a   : > { %v2756_v59 = vsel %vm1348_vm3, %v2735_v56, %v2755_v17 }
 0x70b   : > { %v2757_v20 = vsel %vm1350_vm5, %v2742_v40, %v2756_v59 }
 0x70c   : > { %v2759_v38 = vsel %vm1357_vm7, %v2749_v31, %v2757_v20 }
 0x70d   : > { %3521 = vmatmul.mubr.f32.vlgmr.msra.gmra.mrb[48].mxu1 %v2759_v38 }
 0x7e0   : > { %v2826_v28 = vpop.f32.mrb[48].mxu1 }
 0x7e1   : > { %v2830_v33 = vmul.f32 %v2826_v28, %v2826_v28  ;;  %v3522_v36 = vpop.f32.mrb[49].mxu1 }
 0x7e3   : > { %v2832_v1 = vrot.slane %v2830_v33, 4 }
 0x7e5   : > { %v2834_v30 = vsub.f32 %v2826_v28, %v2832_v1 }
 0x7e7   : > { %v2835_v26 = vmax.f32 %v2834_v30, 0.0 }
 0x7e9   : > { %v2836_v42 = vadd.f32 1e-05, %v2835_v26 }
 0x7eb   : > { %3890 = vrsqrt.f32 %v2836_v42 }
 0x7f5   : > { %v3891_v47 = vpop.eup %3890 }
 0x7f6   : > { %v2842_v6 = vmul.f32 %v3891_v47, %v2841_v25 }
 0x7f8   : > { %v2844_v52 = vrot.slane %v2842_v6, 4  ;;  %v2852_v3 = vcombine.high %v2842_v6, %v2842_v6 }
 0x7fa   : > { %v2846_v57 = vmul.f32 %v2844_v52, %v2826_v28  ;;  %v2859_v8 = vrot.slane %v2852_v3, %v4723_v7 }
 0x7fc   : > { %v2851_v23 = vsub.f32 %v2850_v63, %v2846_v57  ;;  %v2860_v60 = vcombine.high %v2859_v8, %v2859_v8  ;;  %v2867_v24 = vrot.slane %v2859_v8, %v4723_v7 }
 0x7fe   : > { %v2874_v4 = vrot.slane %v2860_v60, %v4723_v7  ;;  %v2875_v14 = vcombine.high %v2867_v24, %v2867_v24  ;;  %v2912_v48 = vrot.slane %v2851_v23, %v4723_v7  ;;  %v2880_v5 = vrot.slane %v2867_v24, %v4704_v45 }
 0x800   : > { %v2876_v34 = vcombine.high %v2874_v4, %v2874_v4  ;;  %v2884_v43 = vrot.slane %v2874_v4, %v4704_v45  ;;  %v2888_v2 = vrot.slane %v2875_v14, %v4704_v45  ;;  %v2913_v41 = vcombine.high %v2912_v48, %v2912_v48 }
 0x801   : > { %v2920_v11 = vrot.slane %v2912_v48, %v4723_v7  ;;  %v2897_v61 = vmul.f32 %v2880_v5, %v4955_v27  ;;  %v2898_v32 = vmul.f32 %v2880_v5, %v4957_v18 }
 0x802   : > { %v2892_v13 = vrot.slane %v2876_v34, %v4704_v45  ;;  %v2927_v55 = vrot.slane %v2913_v41, %v4723_v7  ;;  %v2899_v54 = vmul.f32 %v2884_v43, %v4961_v12  ;;  %v2900_v21 = vmul.f32 %v2884_v43, %v4963_v58 }
 0x803   : > { %v2928_v19 = vcombine.high %v2920_v11, %v2920_v11  ;;  %v2933_v53 = vrot.slane %v2920_v11, %v4704_v45  ;;  %v2901_v29 = vmul.f32 %v2888_v2, %v4965_v0  ;;  %v2902_v7 = vmul.f32 %v2888_v2, %v4967_v50 }
 0x804   : > { %v2929_v35 = vcombine.high %v2927_v55, %v2927_v55  ;;  %v2937_v37 = vrot.slane %v2927_v55, %v4704_v45  ;;  %v2903_v27 = vmul.f32 %v2892_v13, %v4973_v15  ;;  %v2904_v18 = vmul.f32 %v2892_v13, %v4975_v16 }
 0x805   : > { %v2941_v39 = vrot.slane %v2928_v19, %v4704_v45  ;;  %v2950_v22 = vadd.f32 %v2933_v53, %v2897_v61  ;;  %v2951_v12 = vadd.f32 %v2933_v53, %v2898_v32 }
 0x806   : > { %v2945_v58 = vrot.slane %v2929_v35, %v4704_v45  ;;  %v2952_v62 = vadd.f32 %v2937_v37, %v2899_v54  ;;  %v2953_v0 = vadd.f32 %v2937_v37, %v2900_v21 }
 0x807   : > { %v2954_v44 = vadd.f32 %v2941_v39, %v2901_v29  ;;  %2958 = vst [vmem:[%s448_s29] sm:$0xff] %v2950_v22  ;;  %v2955_v9 = vadd.f32 %v2941_v39, %v2902_v7  ;;  %2959 = vst [vmem:[%s448_s29 + $0x8] sm:$0xff] %v2951_v12 }
 0x808   : > { %v2956_v50 = vadd.f32 %v2945_v58, %v2903_v27  ;;  %v2957_v15 = vadd.f32 %v2945_v58, %v2904_v18  ;;  %2960 = vst [vmem:[%s448_s29 + $0x10] sm:$0xff] %v2952_v62  ;;  %2961 = vst [vmem:[%s448_s29 + $0x18] sm:$0xff] %v2953_v0 }
 0x809   : > { %2962 = vst [vmem:[%s448_s29 + $0x20] sm:$0xff] %v2954_v44  ;;  %2963 = vst [vmem:[%s448_s29 + $0x28] sm:$0xff] %v2955_v9 }
 0x80a   : > { %2964 = vst [vmem:[%s448_s29 + $0x30] sm:$0xff] %v2956_v50  ;;  %2965 = vst [vmem:[%s448_s29 + $0x38] sm:$0xff] %v2957_v15 }
 0x80b   : > { %4093 = shalt.err (!%p4090_p8)
}
 0x80c   : > { %s4094_s4 = scalar_lea.hbm %s5037_s26, 1024  ;;  %s4098_s24 = scalar_lea.hbm %s5092_s9, 2048 }
 0x80d   : > { %p4095_p11 = scmp.ne.s32.totalorder %s5037_s26, %s4094_s4  ;;  %p4099_p1 = scmp.lt.u32.totalorder %s5037_s26, %s5092_s9 }
 0x80e   : > { %p4100_p2 = scmp.lt.u32.totalorder %s4098_s24, %s4094_s4  ;;  %p4102_p0 = scmp.lt.u32.totalorder %s4094_s4, %s5037_s26 }
 0x80f   : > { %p4096_p7 = pnand %p4095_p11, %p4396_p10 }
 0x810   : > { %p4101_p13 = por %p4100_p2, %p4099_p1 }
 0x811   : > { %p4097_p12 = pneg %p4096_p7 }
 0x812   : > { %p4103_p4 = por %p4102_p0, %p4101_p13 }
 0x814   : > { %p4104_p6 = pnand %p4103_p4, %p4097_p12 }
 0x816   : > { %4107 = shalt.err (!%p4104_p6)
}
 0x817   : > { %s4182_s21 = smov 128   ;;  %s4183_s16 = smov 8  }
 0x818   : > { %3671 = dma.vmem_to_hbm [thread:$0]  (%p4396_p10), %s5039_s8, 1024, %s5037_s26, %s2967_s7, %s4182_s21, %s4182_s21, %s4183_s16  }
 0x819 PF: > { %s5131_s30 = sld [smem:[#allocation20_spill]]  ;;  %s5132_s29 = sld [smem:[#allocation21_spill]] }
 0x81a   : > { %p5134_p5 = scmp.ge.s32.totalorder %s4162_s12, 2 }
 0x81f   : > { %s2995_s13 = sand.u32 1, %s5131_s30   ;;  %p5133_p3 = scmp.ne.s32.totalorder %s5132_s29, 0 }
 0x820   : > { %s2996_s20 = scalar_lea.sflag [#allocation4], %s2995_s13 }
 0x821   : > { %p3694_p9 = pnand %p5134_p5, %p5133_p3 }
 0x823   : > { %4145 = dma.done.wait (!%p3694_p9), %s2996_s20, 1024  }
 0x824   : > { %4147 = vsyncadd (!%p3694_p9), %s2996_s20, 4294966272  ;;  %s5135_s22 = sld [smem:[#allocation22_spill]]  ;;  %p27_p8 = scmp.ge.s32.totalorder %s4386_s28, 4  }
 0x825   : > { %s5136_s30 = smov %s4154_s10  ;;  %s5137_s10 = smov %s4158_s11 }
 0x826   : > { %s5139_s12 = smov %s4386_s28  ;;  %29 = sbr.rel (!%p27_p8) target bundleno = 14 (0xe), region = 130 }
 0x82a   : > { %s5138_s11 = smov %s5135_s22 }
 0x82d   :  { %3001 = vsyncpa [#allocation3], 1 }
 0x82e   :  { %3003 = vsyncpa [#allocation3 + $0x1], 1 }
 0x82f   :  { %3004 = vsyncpa [#allocation6], 1 }
 0x830   :  { %3006 = vsyncpa [#allocation6 + $0x1], 1 }
 0x831   :  { %3007 = vsyncpa [#allocation9], 1 }
 0x832   :  { %3008 = vsyncpa [#allocation12], 1 }
 0x833   :  { %3009 = vsyncpa [#allocation4], 1 }
 0x834   :  { %3011 = vsyncpa [#allocation4 + $0x1], 1 }

</bundles_post_ra>
